<compile_context>
chip_gen: v5e
topology: v5e:2x2
jax: 0.10.0
libtpu: 0.0.40
codegen_flags: <defaults>
</compile_context>

<pallas_src>
import functools

import jax
import jax.numpy as jnp
from jax.experimental import pallas as pl
from jax.experimental.pallas import tpu as pltpu


# ----------------------------------------------------------------------------
# small helpers
# ----------------------------------------------------------------------------
_MIB = 1024 * 1024


def _round_up(n, m):
    return ((n + m - 1) // m) * m


_ERF_OK = None


def _erf_ok():
    """Probe once whether lax.erf lowers through Mosaic (for exact GELU)."""
    global _ERF_OK
    if _ERF_OK is None:
        def _k(x_ref, o_ref):
            o_ref[...] = jax.lax.erf(x_ref[...])
        try:
            jax.block_until_ready(
                pl.pallas_call(
                    _k, out_shape=jax.ShapeDtypeStruct((8, 128), jnp.float32)
                )(jnp.zeros((8, 128), jnp.float32)))
            _ERF_OK = True
        except Exception:   # any lowering failure -> tanh fallback
            _ERF_OK = False
    return _ERF_OK


def _gelu(x):
    if _erf_ok():
        # exact erf-based GELU, matching torch.nn.GELU() default
        return 0.5 * x * (1.0 + jax.lax.erf(x * 0.7071067811865476))
    # TODO(synk): Mosaic build without erf lowering -> tanh-approx GELU (~1e-3 diff).
    return jax.nn.gelu(x, approximate=True)


def _compiler_params(dims, vmem_estimate=0):
    """dimension_semantics + raise the scoped-VMEM cap only when actually needed."""
    kw = dict(dimension_semantics=dims)
    if vmem_estimate > 16 * _MIB:          # v5e scoped default; never triggers at demo sizes
        kw['vmem_limit_bytes'] = int(min(vmem_estimate * 5 // 4, 100 * _MIB))
    return pltpu.CompilerParams(**kw)


# ----------------------------------------------------------------------------
# Tiled matmul + fused bias / GELU epilogue
# ----------------------------------------------------------------------------
def _mm_kernel(x_ref, w_ref, b_ref, o_ref, acc_ref, *, act, nk):
    @pl.when(pl.program_id(2) == 0)
    def _init():
        acc_ref[...] = jnp.zeros_like(acc_ref)

    acc_ref[...] += jnp.dot(x_ref[...], w_ref[...],
                            preferred_element_type=jnp.float32)

    @pl.when(pl.program_id(2) == nk - 1)
    def _finalize():
        out = acc_ref[...] + b_ref[...].astype(jnp.float32)
        if act == 'gelu':
            out = _gelu(out)
        o_ref[...] = out.astype(o_ref.dtype)


def _tile(dim, pref):
    """Full-dim block when small (allowed by the (8,128) rule), else pad to `pref`."""
    if dim <= pref:
        return dim, dim
    return pref, _round_up(dim, pref)


def matmul_bias_act(x, w, b=None, *, act=None, out_dtype=jnp.float32):
    """(M,K)@(K,N)+b with bf16 operands, f32 accumulator and fused epilogue."""
    M, K = x.shape
    K2, N = w.shape
    assert K == K2
    if b is None:
        b = jnp.zeros((N,), jnp.float32)
    tm, mp = _tile(M, 512)      # M = B*Npatch is the big dim
    tn, np_ = _tile(N, 256)     # 256 matches the v7x 2x256^2 MXU
    tk, kp = _tile(K, 512)
    xp = x if (mp == M and kp == K) else jnp.pad(x, ((0, mp - M), (0, kp - K)))
    wp = w if (kp == K and np_ == N) else jnp.pad(w, ((0, kp - K), (0, np_ - N)))
    bp = b.reshape(1, N)
    if np_ != N:
        bp = jnp.pad(bp, ((0, 0), (0, np_ - N)))
    if xp.dtype != jnp.bfloat16:
        xp = xp.astype(jnp.bfloat16)     # producers already emit bf16 -> usually a no-op
    if wp.dtype != jnp.bfloat16:
        wp = wp.astype(jnp.bfloat16)     # weights pre-cast at init -> usually a no-op
    nk = kp // tk
    vmem_est = (2 * 2 * (tm * tk + tk * tn) + 4 * tm * tn
                + 2 * tm * tn * jnp.dtype(out_dtype).itemsize + 4 * np_)
    out = pl.pallas_call(
        functools.partial(_mm_kernel, act=act, nk=nk),
        out_shape=jax.ShapeDtypeStruct((mp, np_), out_dtype),
        grid=(mp // tm, np_ // tn, nk),
        in_specs=[pl.BlockSpec((tm, tk), lambda i, j, k: (i, k)),
                  pl.BlockSpec((tk, tn), lambda i, j, k: (k, j)),
                  pl.BlockSpec((1, tn), lambda i, j, k: (0, j))],
        out_specs=pl.BlockSpec((tm, tn), lambda i, j, k: (i, j)),
        scratch_shapes=[pltpu.VMEM((tm, tn), jnp.float32)],
        compiler_params=_compiler_params(("parallel", "parallel", "arbitrary"),
                                         vmem_est),
    )(xp, wp, bp)
    if mp != M or np_ != N:
        out = out[:M, :N]
    return out


# ----------------------------------------------------------------------------
# Patch embedding as a fused tap-matmul kernel (no duplicated patch gather)
# ----------------------------------------------------------------------------
def _pe_kernel(xc_ref, w_ref, b_ref, o_ref, *, n_taps, n_out, pad_out):
    d = o_ref.shape[2]
    acc = jnp.zeros((n_out, d), jnp.float32) + b_ref[...].astype(jnp.float32)
    for q in range(n_taps):
        acc = acc + jnp.dot(xc_ref[0, pl.ds(q, n_out), :], w_ref[q],
                            preferred_element_type=jnp.float32)
    out = acc.astype(o_ref.dtype)
    if pad_out > 0:
        zer = jnp.zeros((pad_out, d), o_ref.dtype)
        o_ref[0, pl.ds(0, pad_out), :] = zer                  # halo for the next block
        o_ref[0, pl.ds(pad_out + n_out, pad_out), :] = zer
        o_ref[0, pl.ds(pad_out, n_out), :] = out
    else:
        o_ref[0] = out


def patch_embed(chunks, w_taps, b, n_patch, out_halo):
    """chunks: (B, Nc, S*C) bf16 non-overlapping S-chunks;  output halo-padded."""
    B, Nc, SC = chunks.shape
    nq, _, D = w_taps.shape
    n_rows = n_patch + 2 * out_halo
    vmem_est = (2 * Nc * SC * 2 + nq * SC * D * 2 + 2 * n_rows * D * 2
                + n_patch * D * 4 + 4 * D)
    return pl.pallas_call(
        functools.partial(_pe_kernel, n_taps=nq, n_out=n_patch, pad_out=out_halo),
        out_shape=jax.ShapeDtypeStruct((B, n_rows, D), jnp.bfloat16),
        grid=(B,),
        in_specs=[pl.BlockSpec((1, Nc, SC), lambda i: (i, 0, 0)),
                  pl.BlockSpec((nq, SC, D), lambda i: (0, 0, 0)),
                  pl.BlockSpec((1, D), lambda i: (0, 0))],
        out_specs=pl.BlockSpec((1, n_rows, D), lambda i: (i, 0, 0)),
        compiler_params=_compiler_params(("parallel",), vmem_est),
    )(chunks, w_taps, b.reshape(1, D))


# ----------------------------------------------------------------------------
# Fused ModernTCN Block kernel: grouped conv + BN(folded) + FFN + residual
# ----------------------------------------------------------------------------
def _block_kernel(xp_ref, wdw_ref, bdw_ref, w1_ref, b1_ref, w2_ref, b2_ref,
                  o_ref, *, n_taps, halo, n_out, pad_out):
    d = o_ref.shape[2]
    # Grouped temporal conv: K shifted windows x block-diagonal dense tap weights.
    # (ci = D/C << 128 at ModernTCN sizes -> dense block-diag keeps the MXU filled.)
    y = jnp.zeros((n_out, d), jnp.float32) + bdw_ref[...].astype(jnp.float32)
    for k in range(n_taps):
        y = y + jnp.dot(xp_ref[0, pl.ds(k, n_out), :], wdw_ref[k],
                        preferred_element_type=jnp.float32)
    # pwconv1 (inference BatchNorm folded into w1/b1) -> GELU -> pwconv2 -> residual.
    z = jnp.dot(y.astype(w1_ref.dtype), w1_ref[...],
                preferred_element_type=jnp.float32) + b1_ref[...].astype(jnp.float32)
    z = _gelu(z)
    z = jnp.dot(z.astype(w2_ref.dtype), w2_ref[...],
                preferred_element_type=jnp.float32) + b2_ref[...].astype(jnp.float32)
    res = xp_ref[0, pl.ds(halo, n_out), :].astype(jnp.float32)
    out = (res + z).astype(o_ref.dtype)                       # dropout = identity
    if pad_out > 0:        # emit the output already halo-padded for the next block
        zer = jnp.zeros((pad_out, d), o_ref.dtype)
        o_ref[0, pl.ds(0, pad_out), :] = zer
        o_ref[0, pl.ds(pad_out + n_out, pad_out), :] = zer
        o_ref[0, pl.ds(pad_out, n_out), :] = out
    else:
        o_ref[0] = out


def block_forward(h_padded, bp, cfg, pad_out):
    """One ModernTCN Block as a single fused Pallas kernel (grid over batch).

    `h_padded` is (B, N + K - 1, D) bf16 with zeroed halos (written by the
    previous stage), output is (B, N + 2*pad_out, D) bf16.
    """
    B, npad, D = h_padded.shape
    K = cfg['kernel_size']
    halo = K // 2
    N = npad - 2 * halo
    DR = bp['w1'].shape[1]
    n_rows = N + 2 * pad_out
    vmem_est = (2 * npad * D * 2 + K * D * D * 2 + 2 * D * DR * 2
                + 2 * n_rows * D * 2 + N * D * 4 + N * DR * 4 + 4 * (2 * D + DR))
    return pl.pallas_call(
        functools.partial(_block_kernel, n_taps=K, halo=halo, n_out=N,
                          pad_out=pad_out),
        out_shape=jax.ShapeDtypeStruct((B, n_rows, D), jnp.bfloat16),
        grid=(B,),
        in_specs=[
            pl.BlockSpec((1, npad, D), lambda i: (i, 0, 0)),
            pl.BlockSpec((K, D, D), lambda i: (0, 0, 0)),
            pl.BlockSpec((1, D), lambda i: (0, 0)),
            pl.BlockSpec((D, DR), lambda i: (0, 0)),
            pl.BlockSpec((1, DR), lambda i: (0, 0)),
            pl.BlockSpec((DR, D), lambda i: (0, 0)),
            pl.BlockSpec((1, D), lambda i: (0, 0)),
        ],
        out_specs=pl.BlockSpec((1, n_rows, D), lambda i: (i, 0, 0)),
        compiler_params=_compiler_params(("parallel",), vmem_est),
    )(h_padded, bp['dw_wbd'], bp['dw_b'], bp['w1'], bp['b1'], bp['w2'], bp['b2'])


# ----------------------------------------------------------------------------
# ConvTranspose1d overlap-add: single stacked shifted-sum (no .at[].add passes)
# ----------------------------------------------------------------------------
def _overlap_add(slabs, stride, l_out):
    """slabs: (B, Np, P, C) per-patch outputs -> (B, l_out, C)."""
    B, n_p, P, C = slabs.shape
    nq = -(-P // stride)
    n_chunks = n_p + nq - 1
    parts = []
    for q in range(nq):
        w_q = min(stride, P - q * stride)
        blk = slabs[:, :, q * stride:q * stride + w_q, :]
        if w_q < stride:
            blk = jnp.pad(blk, ((0, 0), (0, 0), (0, stride - w_q), (0, 0)))
        # patch n contributes to output chunk n + q
        blk = jnp.pad(blk, ((0, 0), (q, nq - 1 - q), (0, 0), (0, 0)))
        parts.append(blk)
    buf = jnp.stack(parts, axis=0).sum(axis=0).reshape(B, n_chunks * stride, C)
    if buf.shape[1] >= l_out:
        return buf[:, :l_out, :]
    return jnp.pad(buf, ((0, 0), (0, l_out - buf.shape[1]), (0, 0)))


# ----------------------------------------------------------------------------
# ModernTCN forward
# ----------------------------------------------------------------------------
def modern_tcn_forward(params, x, cfg):
    B, L, C = x.shape
    P, S = cfg['patch_size'], cfg['patch_stride']
    D = cfg['embed_dim']
    K = cfg['kernel_size']
    halo = K // 2
    n_patch = (L - P) // S + 1
    eps = 1e-5

    # RevIN 'norm' -- plain JAX: tiny, mem-bound, and C (nvars) is far below the
    # 128-lane width, so a lane-sparse Pallas kernel would only hurt.
    xf = x.astype(jnp.float32)
    mean = jnp.mean(xf, axis=1, keepdims=True)
    std = jnp.sqrt(jnp.var(xf, axis=1, keepdims=True) + eps)
    xn = (xf - mean) / std * params['revin_w'] + params['revin_b']

    n_blocks = len(params['blocks'])
    out_halo = halo if n_blocks > 0 else 0

    # Patch embedding (Conv1d(C, D, P, stride=S)) -> channels-last (B, Np, D) bf16,
    # emitted already halo-padded for the first block.
    if P % S == 0:
        nq = P // S
        n_chunks = n_patch + nq - 1
        chunks = xn[:, :n_chunks * S, :].reshape(B, n_chunks, S * C)
        chunks = chunks.astype(jnp.bfloat16)
        w_taps = params['pe_w'].reshape(nq, S * C, D)
        h = patch_embed(chunks, w_taps, params['pe_b'], n_patch, out_halo)
    else:
        # TODO(synk): general-stride path falls back to an XLA gather + plain matmul.
        idx = jnp.arange(n_patch)[:, None] * S + jnp.arange(P)[None, :]
        patches = xn[:, idx, :].reshape(B * n_patch, P * C).astype(jnp.bfloat16)
        h = matmul_bias_act(patches, params['pe_w'], params['pe_b'],
                            out_dtype=jnp.bfloat16).reshape(B, n_patch, D)
        if out_halo:
            h = jnp.pad(h, ((0, 0), (out_halo, out_halo), (0, 0)))

    # ModernTCN blocks: one fused Pallas kernel each; halos carried through HBM.
    for bi, bp in enumerate(params['blocks']):
        last = bi == n_blocks - 1
        h = block_forward(h, bp, cfg, 0 if last else halo)

    # Reconstruction head: pointwise conv + GELU (fused epilogue), then
    # ConvTranspose1d = one matmul -> per-patch slabs -> shifted overlap-add.
    z = matmul_bias_act(h.reshape(B * n_patch, D),
                        params['rec1_w'], params['rec1_b'],
                        act='gelu', out_dtype=jnp.bfloat16)
    slabs = matmul_bias_act(z, params['rec2_w'], None, out_dtype=jnp.float32)
    slabs = slabs.reshape(B, n_patch, P, C)
    rec = _overlap_add(slabs, S, L) + params['rec2_b'][None, None, :]
    # TODO(synk): F.interpolate(linear, align_corners=True) fallback omitted; the
    # module's output_padding makes the transpose-conv length == seq_len exactly.

    # RevIN 'denorm'
    out = (rec - params['revin_b']) / (params['revin_w'] + eps * eps) * std + mean
    return out


# ----------------------------------------------------------------------------
# Deterministic parameter construction (PyTorch layouts converted once at init)
# ----------------------------------------------------------------------------
def init_params(key, cfg):
    C, D = cfg['nvars'], cfg['embed_dim']
    P, K, R = cfg['patch_size'], cfg['kernel_size'], cfg['ffn_ratio']
    DR = D * R
    ci = D // C
    eps = 1e-5
    keys = iter(jax.random.split(key, 3 + 3 * cfg['num_blocks']))

    def rnd(shape):
        return 0.05 * jax.random.normal(next(keys), shape, jnp.float32)

    pe_w_pt = rnd((D, C, P))        # nn.Conv1d(C, D, kernel=P) weight
    rec1_w_pt = rnd((DR, D))        # nn.Conv1d(D, DR, 1) weight
    rec2_w_pt = rnd((DR, C, P))     # nn.ConvTranspose1d(DR, C, P) weight

    params = {
        'revin_w': jnp.ones((C,), jnp.float32),
        'revin_b': jnp.zeros((C,), jnp.float32),
        # (P*C, D) matmul layout; cast to bf16 ONCE here (kernels consume directly).
        'pe_w': jnp.transpose(pe_w_pt, (2, 1, 0)).reshape(P * C, D).astype(jnp.bfloat16),
        'pe_b': jnp.zeros((D,), jnp.float32),
        'rec1_w': rec1_w_pt.T.astype(jnp.bfloat16),                       # (D, DR)
        'rec1_b': jnp.zeros((DR,), jnp.float32),
        'rec2_w': jnp.transpose(rec2_w_pt, (0, 2, 1)).reshape(DR, P * C).astype(jnp.bfloat16),
        'rec2_b': jnp.zeros((C,), jnp.float32),
        'blocks': [],
    }
    for _ in range(cfg['num_blocks']):
        dw_w_pt = rnd((D, ci, K))          # grouped Conv1d weight, groups = nvars
        ffn1_w_pt = rnd((DR, D))
        ffn2_w_pt = rnd((D, DR))
        bn_mean = jnp.zeros((D,), jnp.float32)
        bn_var = jnp.ones((D,), jnp.float32)
        bn_gamma = jnp.ones((D,), jnp.float32)
        bn_beta = jnp.zeros((D,), jnp.float32)
        # Dense block-diagonal tap weights (K, D_in, D_out) for the grouped conv
        # (ci = D/C << 128 -> dense form keeps the MXU filled; per-group contraction
        #  only pays off once ci reaches the lane width).
        wbd = jnp.zeros((K, D, D), jnp.float32)
        for g in range(C):
            blk = dw_w_pt[g * ci:(g + 1) * ci]                # (co, cin, K)
            wbd = wbd.at[:, g * ci:(g + 1) * ci, g * ci:(g + 1) * ci].set(
                jnp.transpose(blk, (2, 1, 0)))                # (K, cin, co)
        # Fold inference BatchNorm (applied after the grouped conv) into pwconv1.
        a = bn_gamma / jnp.sqrt(bn_var + eps)
        c = bn_beta - bn_mean * a
        ffn1_w = ffn1_w_pt.T                                   # (D, DR)
        w1 = (ffn1_w * a[:, None]).astype(jnp.bfloat16)
        b1 = (jnp.zeros((DR,), jnp.float32) + c @ ffn1_w).reshape(1, DR)
        w2 = ffn2_w_pt.T.astype(jnp.bfloat16)                  # (DR, D)
        b2 = jnp.zeros((D,), jnp.float32).reshape(1, D)
        params['blocks'].append({
            'dw_wbd': wbd.astype(jnp.bfloat16),
            'dw_b': jnp.zeros((D,), jnp.float32).reshape(1, D),
            'w1': w1, 'b1': b1, 'w2': w2, 'b2': b2,
        })
    return params


if __name__ == "__main__":
    cfg = dict(seq_len=16, nvars=4, patch_size=8, patch_stride=4,
               embed_dim=8, num_blocks=2, kernel_size=5, ffn_ratio=2)
    assert cfg['embed_dim'] % cfg['nvars'] == 0
    assert cfg['kernel_size'] % 2 == 1     # same-length grouped conv (padding = K//2)

    key = jax.random.PRNGKey(0)
    pkey, xkey = jax.random.split(key)
    params = init_params(pkey, cfg)
    x = jax.random.normal(xkey, (2, cfg['seq_len'], cfg['nvars']), jnp.float32)

    _erf_ok()                              # resolve GELU lowering path once, eagerly
    fwd = jax.jit(lambda p, xx: modern_tcn_forward(p, xx, cfg))
    out = fwd(params, x)
    jax.block_until_ready(out)
    assert out.shape == x.shape and out.dtype == jnp.float32
    print("KERNEL_OK")
</pallas_src>

<mosaic_0001>
module attributes {stable_mosaic.version = 11 : i64} {
  func.func @_k(%arg0: memref<8x128xf32, #tpu.memory_space<vmem>>, %arg1: memref<8x128xf32, #tpu.memory_space<vmem>>) attributes {dimension_semantics = [], scalar_prefetch = 0 : i64, scratch_operands = 0 : i64, tpu.core_type = #tpu.core_type<tc>} {
    %c0 = arith.constant 0 : index
    %c0_0 = arith.constant 0 : index
    %0 = vector.load %arg0[%c0, %c0_0] : memref<8x128xf32, #tpu.memory_space<vmem>>, vector<8x128xf32>
    %1 = math.erf %0 : vector<8x128xf32>
    %c0_1 = arith.constant 0 : index
    %c0_2 = arith.constant 0 : index
    %2 = vector.load %arg1[%c0_1, %c0_2] : memref<8x128xf32, #tpu.memory_space<vmem>>, vector<8x128xf32>
    tpu.vector_store %arg1[%c0_1, %c0_2], %1 {strides = array<i32>} : memref<8x128xf32, #tpu.memory_space<vmem>>, vector<8x128xf32>,
    return
  }
}

module attributes {stable_mosaic.version = 11 : i64} {
  func.func @_block_kernel(%arg0: i32, %arg1: memref<1x7x8xbf16, #tpu.memory_space<vmem>>, %arg2: memref<5x8x8xbf16, #tpu.memory_space<vmem>>, %arg3: memref<1x8xf32, #tpu.memory_space<vmem>>, %arg4: memref<8x16xbf16, #tpu.memory_space<vmem>>, %arg5: memref<1x16xf32, #tpu.memory_space<vmem>>, %arg6: memref<16x8xbf16, #tpu.memory_space<vmem>>, %arg7: memref<1x8xf32, #tpu.memory_space<vmem>>, %arg8: memref<1x3x8xbf16, #tpu.memory_space<vmem>>) attributes {dimension_semantics = [#tpu.dimension_semantics<parallel>], iteration_bounds = array<i64: 2>, scalar_prefetch = 0 : i64, scratch_operands = 0 : i64, tpu.core_type = #tpu.core_type<tc>, window_params = [{transform_indices = @transform_0, window_bounds = array<i64: 1, 7, 8>}, {pipeline_mode = #tpu.pipeline_mode<synchronous>, transform_indices = @transform_1, window_bounds = array<i64: 5, 8, 8>}, {pipeline_mode = #tpu.pipeline_mode<synchronous>, transform_indices = @transform_2, window_bounds = array<i64: 1, 8>}, {pipeline_mode = #tpu.pipeline_mode<synchronous>, transform_indices = @transform_3, window_bounds = array<i64: 8, 16>}, {pipeline_mode = #tpu.pipeline_mode<synchronous>, transform_indices = @transform_4, window_bounds = array<i64: 1, 16>}, {pipeline_mode = #tpu.pipeline_mode<synchronous>, transform_indices = @transform_5, window_bounds = array<i64: 16, 8>}, {pipeline_mode = #tpu.pipeline_mode<synchronous>, transform_indices = @transform_6, window_bounds = array<i64: 1, 8>}, {transform_indices = @transform_7, window_bounds = array<i64: 1, 3, 8>}]} {
    %cst = arith.constant 0.000000e+00 : f32
    %0 = vector.broadcast %cst : f32 to vector<3x8xf32>
    %c0 = arith.constant 0 : index
    %c0_0 = arith.constant 0 : index
    %1 = vector.load %arg3[%c0, %c0_0] : memref<1x8xf32, #tpu.memory_space<vmem>>, vector<1x8xf32>
    %2 = vector.broadcast %1 : vector<1x8xf32> to vector<3x8xf32>
    %3 = arith.addf %0, %2 : vector<3x8xf32>
    %c0_1 = arith.constant 0 : index
    %c0_2 = arith.constant 0 : index
    %c0_3 = arith.constant 0 : index
    %4 = vector.load %arg1[%c0_1, %c0_2, %c0_3] : memref<1x7x8xbf16, #tpu.memory_space<vmem>>, vector<1x3x8xbf16>
    %5 = vector.shape_cast %4 : vector<1x3x8xbf16> to vector<3x8xbf16>
    %c0_4 = arith.constant 0 : index
    %c0_5 = arith.constant 0 : index
    %c0_6 = arith.constant 0 : index
    %6 = vector.load %arg2[%c0_4, %c0_5, %c0_6] : memref<5x8x8xbf16, #tpu.memory_space<vmem>>, vector<1x8x8xbf16>
    %7 = vector.shape_cast %6 : vector<1x8x8xbf16> to vector<8x8xbf16>
    %cst_7 = arith.constant dense<0.000000e+00> : vector<3x8xf32>
    %8 = tpu.matmul %5, %7, %cst_7 {dimension_numbers = #tpu.dot_dimension_numbers<[1], [0], [0], [1], [0, 0, 1, 1], [], []>} : vector<3x8xbf16>, vector<8x8xbf16>, vector<3x8xf32> -> vector<3x8xf32>
    %9 = arith.addf %3, %8 : vector<3x8xf32>
    %c0_8 = arith.constant 0 : index
    %c1 = arith.constant 1 : index
    %c0_9 = arith.constant 0 : index
    %10 = vector.load %arg1[%c0_8, %c1, %c0_9] : memref<1x7x8xbf16, #tpu.memory_space<vmem>>, vector<1x3x8xbf16>
    %11 = vector.shape_cast %10 : vector<1x3x8xbf16> to vector<3x8xbf16>
    %c1_10 = arith.constant 1 : index
    %c0_11 = arith.constant 0 : index
    %c0_12 = arith.constant 0 : index
    %12 = vector.load %arg2[%c1_10, %c0_11, %c0_12] : memref<5x8x8xbf16, #tpu.memory_space<vmem>>, vector<1x8x8xbf16>
    %13 = vector.shape_cast %12 : vector<1x8x8xbf16> to vector<8x8xbf16>
    %cst_13 = arith.constant dense<0.000000e+00> : vector<3x8xf32>
    %14 = tpu.matmul %11, %13, %cst_13 {dimension_numbers = #tpu.dot_dimension_numbers<[1], [0], [0], [1], [0, 0, 1, 1], [], []>} : vector<3x8xbf16>, vector<8x8xbf16>, vector<3x8xf32> -> vector<3x8xf32>
    %15 = arith.addf %9, %14 : vector<3x8xf32>
    %c0_14 = arith.constant 0 : index
    %c2 = arith.constant 2 : index
    %c0_15 = arith.constant 0 : index
    %16 = vector.load %arg1[%c0_14, %c2, %c0_15] : memref<1x7x8xbf16, #tpu.memory_space<vmem>>, vector<1x3x8xbf16>
    %17 = vector.shape_cast %16 : vector<1x3x8xbf16> to vector<3x8xbf16>
    %c2_16 = arith.constant 2 : index
    %c0_17 = arith.constant 0 : index
    %c0_18 = arith.constant 0 : index
    %18 = vector.load %arg2[%c2_16, %c0_17, %c0_18] : memref<5x8x8xbf16, #tpu.memory_space<vmem>>, vector<1x8x8xbf16>
    %19 = vector.shape_cast %18 : vector<1x8x8xbf16> to vector<8x8xbf16>
    %cst_19 = arith.constant dense<0.000000e+00> : vector<3x8xf32>
    %20 = tpu.matmul %17, %19, %cst_19 {dimension_numbers = #tpu.dot_dimension_numbers<[1], [0], [0], [1], [0, 0, 1, 1], [], []>} : vector<3x8xbf16>, vector<8x8xbf16>, vector<3x8xf32> -> vector<3x8xf32>
    %21 = arith.addf %15, %20 : vector<3x8xf32>
    %c0_20 = arith.constant 0 : index
    %c3 = arith.constant 3 : index
    %c0_21 = arith.constant 0 : index
    %22 = vector.load %arg1[%c0_20, %c3, %c0_21] : memref<1x7x8xbf16, #tpu.memory_space<vmem>>, vector<1x3x8xbf16>
    %23 = vector.shape_cast %22 : vector<1x3x8xbf16> to vector<3x8xbf16>
    %c3_22 = arith.constant 3 : index
    %c0_23 = arith.constant 0 : index
    %c0_24 = arith.constant 0 : index
    %24 = vector.load %arg2[%c3_22, %c0_23, %c0_24] : memref<5x8x8xbf16, #tpu.memory_space<vmem>>, vector<1x8x8xbf16>
    %25 = vector.shape_cast %24 : vector<1x8x8xbf16> to vector<8x8xbf16>
    %cst_25 = arith.constant dense<0.000000e+00> : vector<3x8xf32>
    %26 = tpu.matmul %23, %25, %cst_25 {dimension_numbers = #tpu.dot_dimension_numbers<[1], [0], [0], [1], [0, 0, 1, 1], [], []>} : vector<3x8xbf16>, vector<8x8xbf16>, vector<3x8xf32> -> vector<3x8xf32>
    %27 = arith.addf %21, %26 : vector<3x8xf32>
    %c0_26 = arith.constant 0 : index
    %c4 = arith.constant 4 : index
    %c0_27 = arith.constant 0 : index
    %28 = vector.load %arg1[%c0_26, %c4, %c0_27] : memref<1x7x8xbf16, #tpu.memory_space<vmem>>, vector<1x3x8xbf16>
    %29 = vector.shape_cast %28 : vector<1x3x8xbf16> to vector<3x8xbf16>
    %c4_28 = arith.constant 4 : index
    %c0_29 = arith.constant 0 : index
    %c0_30 = arith.constant 0 : index
    %30 = vector.load %arg2[%c4_28, %c0_29, %c0_30] : memref<5x8x8xbf16, #tpu.memory_space<vmem>>, vector<1x8x8xbf16>
    %31 = vector.shape_cast %30 : vector<1x8x8xbf16> to vector<8x8xbf16>
    %cst_31 = arith.constant dense<0.000000e+00> : vector<3x8xf32>
    %32 = tpu.matmul %29, %31, %cst_31 {dimension_numbers = #tpu.dot_dimension_numbers<[1], [0], [0], [1], [0, 0, 1, 1], [], []>} : vector<3x8xbf16>, vector<8x8xbf16>, vector<3x8xf32> -> vector<3x8xf32>
    %33 = arith.addf %27, %32 : vector<3x8xf32>
    %34 = arith.truncf %33 : vector<3x8xf32> to vector<3x8xbf16>
    %c0_32 = arith.constant 0 : index
    %c0_33 = arith.constant 0 : index
    %35 = vector.load %arg4[%c0_32, %c0_33] : memref<8x16xbf16, #tpu.memory_space<vmem>>, vector<8x16xbf16>
    %cst_34 = arith.constant dense<0.000000e+00> : vector<3x16xf32>
    %36 = tpu.matmul %34, %35, %cst_34 {dimension_numbers = #tpu.dot_dimension_numbers<[1], [0], [0], [1], [0, 0, 1, 1], [], []>} : vector<3x8xbf16>, vector<8x16xbf16>, vector<3x16xf32> -> vector<3x16xf32>
    %c0_35 = arith.constant 0 : index
    %c0_36 = arith.constant 0 : index
    %37 = vector.load %arg5[%c0_35, %c0_36] : memref<1x16xf32, #tpu.memory_space<vmem>>, vector<1x16xf32>
    %38 = vector.broadcast %37 : vector<1x16xf32> to vector<3x16xf32>
    %39 = arith.addf %36, %38 : vector<3x16xf32>
    %40 = arith.mulf %39, %39 : vector<3x16xf32>
    %41 = arith.mulf %39, %40 : vector<3x16xf32>
    %cst_37 = arith.constant 4.471500e-02 : f32
    %42 = vector.broadcast %cst_37 : f32 to vector<3x16xf32>
    %43 = arith.mulf %42, %41 : vector<3x16xf32>
    %44 = arith.addf %39, %43 : vector<3x16xf32>
    %cst_38 = arith.constant 0.797884583 : f32
    %45 = vector.broadcast %cst_38 : f32 to vector<3x16xf32>
    %46 = arith.mulf %45, %44 : vector<3x16xf32>
    %47 = math.tanh %46 : vector<3x16xf32>
    %cst_39 = arith.constant 1.000000e+00 : f32
    %48 = vector.broadcast %cst_39 : f32 to vector<3x16xf32>
    %49 = arith.addf %48, %47 : vector<3x16xf32>
    %cst_40 = arith.constant 5.000000e-01 : f32
    %50 = vector.broadcast %cst_40 : f32 to vector<3x16xf32>
    %51 = arith.mulf %50, %49 : vector<3x16xf32>
    %52 = arith.mulf %39, %51 : vector<3x16xf32>
    %53 = arith.truncf %52 : vector<3x16xf32> to vector<3x16xbf16>
    %c0_41 = arith.constant 0 : index
    %c0_42 = arith.constant 0 : index
    %54 = vector.load %arg6[%c0_41, %c0_42] : memref<16x8xbf16, #tpu.memory_space<vmem>>, vector<16x8xbf16>
    %cst_43 = arith.constant dense<0.000000e+00> : vector<3x8xf32>
    %55 = tpu.matmul %53, %54, %cst_43 {dimension_numbers = #tpu.dot_dimension_numbers<[1], [0], [0], [1], [0, 0, 1, 1], [], []>} : vector<3x16xbf16>, vector<16x8xbf16>, vector<3x8xf32> -> vector<3x8xf32>
    %c0_44 = arith.constant 0 : index
    %c0_45 = arith.constant 0 : index
    %56 = vector.load %arg7[%c0_44, %c0_45] : memref<1x8xf32, #tpu.memory_space<vmem>>, vector<1x8xf32>
    %57 = vector.broadcast %56 : vector<1x8xf32> to vector<3x8xf32>
    %58 = arith.addf %55, %57 : vector<3x8xf32>
    %c0_46 = arith.constant 0 : index
    %c2_47 = arith.constant 2 : index
    %c0_48 = arith.constant 0 : index
    %59 = vector.load %arg1[%c0_46, %c2_47, %c0_48] : memref<1x7x8xbf16, #tpu.memory_space<vmem>>, vector<1x3x8xbf16>
    %60 = vector.shape_cast %59 : vector<1x3x8xbf16> to vector<3x8xbf16>
    %61 = arith.extf %60 : vector<3x8xbf16> to vector<3x8xf32>
    %62 = arith.addf %61, %58 : vector<3x8xf32>
    %63 = arith.truncf %62 : vector<3x8xf32> to vector<3x8xbf16>
    %c0_49 = arith.constant 0 : index
    %c0_50 = arith.constant 0 : index
    %c0_51 = arith.constant 0 : index
    %64 = vector.load %arg8[%c0_49, %c0_50, %c0_51] : memref<1x3x8xbf16, #tpu.memory_space<vmem>>, vector<1x3x8xbf16>
    %65 = vector.shape_cast %64 : vector<1x3x8xbf16> to vector<3x8xbf16>
    %66 = vector.shape_cast %63 : vector<3x8xbf16> to vector<1x3x8xbf16>
    tpu.vector_store %arg8[%c0_49, %c0_50, %c0_51], %66 {strides = array<i32>} : memref<1x3x8xbf16, #tpu.memory_space<vmem>>, vector<1x3x8xbf16>,
    return
  }
  func.func @transform_0(%arg0: i32) -> (i32, i32, i32) {
    %c0_i32 = arith.constant 0 : i32
    %c0_i32_0 = arith.constant 0 : i32
    %c0_i32_1 = arith.constant 0 : i32
    return %arg0, %c0_i32, %c0_i32_0 : i32, i32, i32
  }
  func.func @transform_1(%arg0: i32) -> (i32, i32, i32) {
    %c0_i32 = arith.constant 0 : i32
    %c0_i32_0 = arith.constant 0 : i32
    %c0_i32_1 = arith.constant 0 : i32
    %c0_i32_2 = arith.constant 0 : i32
    return %c0_i32, %c0_i32_0, %c0_i32_1 : i32, i32, i32
  }
  func.func @transform_2(%arg0: i32) -> (i32, i32) {
    %c0_i32 = arith.constant 0 : i32
    %c0_i32_0 = arith.constant 0 : i32
    %c0_i32_1 = arith.constant 0 : i32
    return %c0_i32, %c0_i32_0 : i32, i32
  }
  func.func @transform_3(%arg0: i32) -> (i32, i32) {
    %c0_i32 = arith.constant 0 : i32
    %c0_i32_0 = arith.constant 0 : i32
    %c0_i32_1 = arith.constant 0 : i32
    return %c0_i32, %c0_i32_0 : i32, i32
  }
  func.func @transform_4(%arg0: i32) -> (i32, i32) {
    %c0_i32 = arith.constant 0 : i32
    %c0_i32_0 = arith.constant 0 : i32
    %c0_i32_1 = arith.constant 0 : i32
    return %c0_i32, %c0_i32_0 : i32, i32
  }
  func.func @transform_5(%arg0: i32) -> (i32, i32) {
    %c0_i32 = arith.constant 0 : i32
    %c0_i32_0 = arith.constant 0 : i32
    %c0_i32_1 = arith.constant 0 : i32
    return %c0_i32, %c0_i32_0 : i32, i32
  }
  func.func @transform_6(%arg0: i32) -> (i32, i32) {
    %c0_i32 = arith.constant 0 : i32
    %c0_i32_0 = arith.constant 0 : i32
    %c0_i32_1 = arith.constant 0 : i32
    return %c0_i32, %c0_i32_0 : i32, i32
  }
  func.func @transform_7(%arg0: i32) -> (i32, i32, i32) {
    %c0_i32 = arith.constant 0 : i32
    %c0_i32_0 = arith.constant 0 : i32
    %c0_i32_1 = arith.constant 0 : i32
    return %arg0, %c0_i32, %c0_i32_0 : i32, i32, i32
  }
}

module attributes {stable_mosaic.version = 11 : i64} {
  func.func @_pe_kernel(%arg0: i32, %arg1: memref<1x4x16xbf16, #tpu.memory_space<vmem>>, %arg2: memref<2x16x8xbf16, #tpu.memory_space<vmem>>, %arg3: memref<1x8xf32, #tpu.memory_space<vmem>>, %arg4: memref<1x7x8xbf16, #tpu.memory_space<vmem>>) attributes {dimension_semantics = [#tpu.dimension_semantics<parallel>], iteration_bounds = array<i64: 2>, scalar_prefetch = 0 : i64, scratch_operands = 0 : i64, tpu.core_type = #tpu.core_type<tc>, window_params = [{transform_indices = @transform_0, window_bounds = array<i64: 1, 4, 16>}, {pipeline_mode = #tpu.pipeline_mode<synchronous>, transform_indices = @transform_1, window_bounds = array<i64: 2, 16, 8>}, {pipeline_mode = #tpu.pipeline_mode<synchronous>, transform_indices = @transform_2, window_bounds = array<i64: 1, 8>}, {transform_indices = @transform_3, window_bounds = array<i64: 1, 7, 8>}]} {
    %cst = arith.constant 0.000000e+00 : f32
    %0 = vector.broadcast %cst : f32 to vector<3x8xf32>
    %c0 = arith.constant 0 : index
    %c0_0 = arith.constant 0 : index
    %1 = vector.load %arg3[%c0, %c0_0] : memref<1x8xf32, #tpu.memory_space<vmem>>, vector<1x8xf32>
    %2 = vector.broadcast %1 : vector<1x8xf32> to vector<3x8xf32>
    %3 = arith.addf %0, %2 : vector<3x8xf32>
    %c0_1 = arith.constant 0 : index
    %c0_2 = arith.constant 0 : index
    %c0_3 = arith.constant 0 : index
    %4 = vector.load %arg1[%c0_1, %c0_2, %c0_3] : memref<1x4x16xbf16, #tpu.memory_space<vmem>>, vector<1x3x16xbf16>
    %5 = vector.shape_cast %4 : vector<1x3x16xbf16> to vector<3x16xbf16>
    %c0_4 = arith.constant 0 : index
    %c0_5 = arith.constant 0 : index
    %c0_6 = arith.constant 0 : index
    %6 = vector.load %arg2[%c0_4, %c0_5, %c0_6] : memref<2x16x8xbf16, #tpu.memory_space<vmem>>, vector<1x16x8xbf16>
    %7 = vector.shape_cast %6 : vector<1x16x8xbf16> to vector<16x8xbf16>
    %cst_7 = arith.constant dense<0.000000e+00> : vector<3x8xf32>
    %8 = tpu.matmul %5, %7, %cst_7 {dimension_numbers = #tpu.dot_dimension_numbers<[1], [0], [0], [1], [0, 0, 1, 1], [], []>} : vector<3x16xbf16>, vector<16x8xbf16>, vector<3x8xf32> -> vector<3x8xf32>
    %9 = arith.addf %3, %8 : vector<3x8xf32>
    %c0_8 = arith.constant 0 : index
    %c1 = arith.constant 1 : index
    %c0_9 = arith.constant 0 : index
    %10 = vector.load %arg1[%c0_8, %c1, %c0_9] : memref<1x4x16xbf16, #tpu.memory_space<vmem>>, vector<1x3x16xbf16>
    %11 = vector.shape_cast %10 : vector<1x3x16xbf16> to vector<3x16xbf16>
    %c1_10 = arith.constant 1 : index
    %c0_11 = arith.constant 0 : index
    %c0_12 = arith.constant 0 : index
    %12 = vector.load %arg2[%c1_10, %c0_11, %c0_12] : memref<2x16x8xbf16, #tpu.memory_space<vmem>>, vector<1x16x8xbf16>
    %13 = vector.shape_cast %12 : vector<1x16x8xbf16> to vector<16x8xbf16>
    %cst_13 = arith.constant dense<0.000000e+00> : vector<3x8xf32>
    %14 = tpu.matmul %11, %13, %cst_13 {dimension_numbers = #tpu.dot_dimension_numbers<[1], [0], [0], [1], [0, 0, 1, 1], [], []>} : vector<3x16xbf16>, vector<16x8xbf16>, vector<3x8xf32> -> vector<3x8xf32>
    %15 = arith.addf %9, %14 : vector<3x8xf32>
    %16 = arith.truncf %15 : vector<3x8xf32> to vector<3x8xbf16>
    %cst_14 = arith.constant 0.000000e+00 : bf16
    %17 = vector.broadcast %cst_14 : bf16 to vector<2x8xbf16>
    %c0_15 = arith.constant 0 : index
    %c0_16 = arith.constant 0 : index
    %c0_17 = arith.constant 0 : index
    %18 = vector.load %arg4[%c0_15, %c0_16, %c0_17] : memref<1x7x8xbf16, #tpu.memory_space<vmem>>, vector<1x2x8xbf16>
    %19 = vector.shape_cast %18 : vector<1x2x8xbf16> to vector<2x8xbf16>
    %20 = vector.shape_cast %17 : vector<2x8xbf16> to vector<1x2x8xbf16>
    tpu.vector_store %arg4[%c0_15, %c0_16, %c0_17], %20 {strides = array<i32>} : memref<1x7x8xbf16, #tpu.memory_space<vmem>>, vector<1x2x8xbf16>,
    %c0_18 = arith.constant 0 : index
    %c5 = arith.constant 5 : index
    %c0_19 = arith.constant 0 : index
    %21 = vector.load %arg4[%c0_18, %c5, %c0_19] : memref<1x7x8xbf16, #tpu.memory_space<vmem>>, vector<1x2x8xbf16>
    %22 = vector.shape_cast %21 : vector<1x2x8xbf16> to vector<2x8xbf16>
    %23 = vector.shape_cast %17 : vector<2x8xbf16> to vector<1x2x8xbf16>
    tpu.vector_store %arg4[%c0_18, %c5, %c0_19], %23 {strides = array<i32>} : memref<1x7x8xbf16, #tpu.memory_space<vmem>>, vector<1x2x8xbf16>,
    %c0_20 = arith.constant 0 : index
    %c2 = arith.constant 2 : index
    %c0_21 = arith.constant 0 : index
    %24 = vector.load %arg4[%c0_20, %c2, %c0_21] : memref<1x7x8xbf16, #tpu.memory_space<vmem>>, vector<1x3x8xbf16>
    %25 = vector.shape_cast %24 : vector<1x3x8xbf16> to vector<3x8xbf16>
    %26 = vector.shape_cast %16 : vector<3x8xbf16> to vector<1x3x8xbf16>
    tpu.vector_store %arg4[%c0_20, %c2, %c0_21], %26 {strides = array<i32>} : memref<1x7x8xbf16, #tpu.memory_space<vmem>>, vector<1x3x8xbf16>,
    return
  }
  func.func @transform_0(%arg0: i32) -> (i32, i32, i32) {
    %c0_i32 = arith.constant 0 : i32
    %c0_i32_0 = arith.constant 0 : i32
    %c0_i32_1 = arith.constant 0 : i32
    return %arg0, %c0_i32, %c0_i32_0 : i32, i32, i32
  }
  func.func @transform_1(%arg0: i32) -> (i32, i32, i32) {
    %c0_i32 = arith.constant 0 : i32
    %c0_i32_0 = arith.constant 0 : i32
    %c0_i32_1 = arith.constant 0 : i32
    %c0_i32_2 = arith.constant 0 : i32
    return %c0_i32, %c0_i32_0, %c0_i32_1 : i32, i32, i32
  }
  func.func @transform_2(%arg0: i32) -> (i32, i32) {
    %c0_i32 = arith.constant 0 : i32
    %c0_i32_0 = arith.constant 0 : i32
    %c0_i32_1 = arith.constant 0 : i32
    return %c0_i32, %c0_i32_0 : i32, i32
  }
  func.func @transform_3(%arg0: i32) -> (i32, i32, i32) {
    %c0_i32 = arith.constant 0 : i32
    %c0_i32_0 = arith.constant 0 : i32
    %c0_i32_1 = arith.constant 0 : i32
    return %arg0, %c0_i32, %c0_i32_0 : i32, i32, i32
  }
}

module attributes {stable_mosaic.version = 11 : i64} {
  func.func @_block_kernel(%arg0: i32, %arg1: memref<1x7x8xbf16, #tpu.memory_space<vmem>>, %arg2: memref<5x8x8xbf16, #tpu.memory_space<vmem>>, %arg3: memref<1x8xf32, #tpu.memory_space<vmem>>, %arg4: memref<8x16xbf16, #tpu.memory_space<vmem>>, %arg5: memref<1x16xf32, #tpu.memory_space<vmem>>, %arg6: memref<16x8xbf16, #tpu.memory_space<vmem>>, %arg7: memref<1x8xf32, #tpu.memory_space<vmem>>, %arg8: memref<1x7x8xbf16, #tpu.memory_space<vmem>>) attributes {dimension_semantics = [#tpu.dimension_semantics<parallel>], iteration_bounds = array<i64: 2>, scalar_prefetch = 0 : i64, scratch_operands = 0 : i64, tpu.core_type = #tpu.core_type<tc>, window_params = [{transform_indices = @transform_0, window_bounds = array<i64: 1, 7, 8>}, {pipeline_mode = #tpu.pipeline_mode<synchronous>, transform_indices = @transform_1, window_bounds = array<i64: 5, 8, 8>}, {pipeline_mode = #tpu.pipeline_mode<synchronous>, transform_indices = @transform_2, window_bounds = array<i64: 1, 8>}, {pipeline_mode = #tpu.pipeline_mode<synchronous>, transform_indices = @transform_3, window_bounds = array<i64: 8, 16>}, {pipeline_mode = #tpu.pipeline_mode<synchronous>, transform_indices = @transform_4, window_bounds = array<i64: 1, 16>}, {pipeline_mode = #tpu.pipeline_mode<synchronous>, transform_indices = @transform_5, window_bounds = array<i64: 16, 8>}, {pipeline_mode = #tpu.pipeline_mode<synchronous>, transform_indices = @transform_6, window_bounds = array<i64: 1, 8>}, {transform_indices = @transform_7, window_bounds = array<i64: 1, 7, 8>}]} {
    %cst = arith.constant 0.000000e+00 : f32
    %0 = vector.broadcast %cst : f32 to vector<3x8xf32>
    %c0 = arith.constant 0 : index
    %c0_0 = arith.constant 0 : index
    %1 = vector.load %arg3[%c0, %c0_0] : memref<1x8xf32, #tpu.memory_space<vmem>>, vector<1x8xf32>
    %2 = vector.broadcast %1 : vector<1x8xf32> to vector<3x8xf32>
    %3 = arith.addf %0, %2 : vector<3x8xf32>
    %c0_1 = arith.constant 0 : index
    %c0_2 = arith.constant 0 : index
    %c0_3 = arith.constant 0 : index
    %4 = vector.load %arg1[%c0_1, %c0_2, %c0_3] : memref<1x7x8xbf16, #tpu.memory_space<vmem>>, vector<1x3x8xbf16>
    %5 = vector.shape_cast %4 : vector<1x3x8xbf16> to vector<3x8xbf16>
    %c0_4 = arith.constant 0 : index
    %c0_5 = arith.constant 0 : index
    %c0_6 = arith.constant 0 : index
    %6 = vector.load %arg2[%c0_4, %c0_5, %c0_6] : memref<5x8x8xbf16, #tpu.memory_space<vmem>>, vector<1x8x8xbf16>
    %7 = vector.shape_cast %6 : vector<1x8x8xbf16> to vector<8x8xbf16>
    %cst_7 = arith.constant dense<0.000000e+00> : vector<3x8xf32>
    %8 = tpu.matmul %5, %7, %cst_7 {dimension_numbers = #tpu.dot_dimension_numbers<[1], [0], [0], [1], [0, 0, 1, 1], [], []>} : vector<3x8xbf16>, vector<8x8xbf16>, vector<3x8xf32> -> vector<3x8xf32>
    %9 = arith.addf %3, %8 : vector<3x8xf32>
    %c0_8 = arith.constant 0 : index
    %c1 = arith.constant 1 : index
    %c0_9 = arith.constant 0 : index
    %10 = vector.load %arg1[%c0_8, %c1, %c0_9] : memref<1x7x8xbf16, #tpu.memory_space<vmem>>, vector<1x3x8xbf16>
    %11 = vector.shape_cast %10 : vector<1x3x8xbf16> to vector<3x8xbf16>
    %c1_10 = arith.constant 1 : index
    %c0_11 = arith.constant 0 : index
    %c0_12 = arith.constant 0 : index
    %12 = vector.load %arg2[%c1_10, %c0_11, %c0_12] : memref<5x8x8xbf16, #tpu.memory_space<vmem>>, vector<1x8x8xbf16>
    %13 = vector.shape_cast %12 : vector<1x8x8xbf16> to vector<8x8xbf16>
    %cst_13 = arith.constant dense<0.000000e+00> : vector<3x8xf32>
    %14 = tpu.matmul %11, %13, %cst_13 {dimension_numbers = #tpu.dot_dimension_numbers<[1], [0], [0], [1], [0, 0, 1, 1], [], []>} : vector<3x8xbf16>, vector<8x8xbf16>, vector<3x8xf32> -> vector<3x8xf32>
    %15 = arith.addf %9, %14 : vector<3x8xf32>
    %c0_14 = arith.constant 0 : index
    %c2 = arith.constant 2 : index
    %c0_15 = arith.constant 0 : index
    %16 = vector.load %arg1[%c0_14, %c2, %c0_15] : memref<1x7x8xbf16, #tpu.memory_space<vmem>>, vector<1x3x8xbf16>
    %17 = vector.shape_cast %16 : vector<1x3x8xbf16> to vector<3x8xbf16>
    %c2_16 = arith.constant 2 : index
    %c0_17 = arith.constant 0 : index
    %c0_18 = arith.constant 0 : index
    %18 = vector.load %arg2[%c2_16, %c0_17, %c0_18] : memref<5x8x8xbf16, #tpu.memory_space<vmem>>, vector<1x8x8xbf16>
    %19 = vector.shape_cast %18 : vector<1x8x8xbf16> to vector<8x8xbf16>
    %cst_19 = arith.constant dense<0.000000e+00> : vector<3x8xf32>
    %20 = tpu.matmul %17, %19, %cst_19 {dimension_numbers = #tpu.dot_dimension_numbers<[1], [0], [0], [1], [0, 0, 1, 1], [], []>} : vector<3x8xbf16>, vector<8x8xbf16>, vector<3x8xf32> -> vector<3x8xf32>
    %21 = arith.addf %15, %20 : vector<3x8xf32>
    %c0_20 = arith.constant 0 : index
    %c3 = arith.constant 3 : index
    %c0_21 = arith.constant 0 : index
    %22 = vector.load %arg1[%c0_20, %c3, %c0_21] : memref<1x7x8xbf16, #tpu.memory_space<vmem>>, vector<1x3x8xbf16>
    %23 = vector.shape_cast %22 : vector<1x3x8xbf16> to vector<3x8xbf16>
    %c3_22 = arith.constant 3 : index
    %c0_23 = arith.constant 0 : index
    %c0_24 = arith.constant 0 : index
    %24 = vector.load %arg2[%c3_22, %c0_23, %c0_24] : memref<5x8x8xbf16, #tpu.memory_space<vmem>>, vector<1x8x8xbf16>
    %25 = vector.shape_cast %24 : vector<1x8x8xbf16> to vector<8x8xbf16>
    %cst_25 = arith.constant dense<0.000000e+00> : vector<3x8xf32>
    %26 = tpu.matmul %23, %25, %cst_25 {dimension_numbers = #tpu.dot_dimension_numbers<[1], [0], [0], [1], [0, 0, 1, 1], [], []>} : vector<3x8xbf16>, vector<8x8xbf16>, vector<3x8xf32> -> vector<3x8xf32>
    %27 = arith.addf %21, %26 : vector<3x8xf32>
    %c0_26 = arith.constant 0 : index
    %c4 = arith.constant 4 : index
    %c0_27 = arith.constant 0 : index
    %28 = vector.load %arg1[%c0_26, %c4, %c0_27] : memref<1x7x8xbf16, #tpu.memory_space<vmem>>, vector<1x3x8xbf16>
    %29 = vector.shape_cast %28 : vector<1x3x8xbf16> to vector<3x8xbf16>
    %c4_28 = arith.constant 4 : index
    %c0_29 = arith.constant 0 : index
    %c0_30 = arith.constant 0 : index
    %30 = vector.load %arg2[%c4_28, %c0_29, %c0_30] : memref<5x8x8xbf16, #tpu.memory_space<vmem>>, vector<1x8x8xbf16>
    %31 = vector.shape_cast %30 : vector<1x8x8xbf16> to vector<8x8xbf16>
    %cst_31 = arith.constant dense<0.000000e+00> : vector<3x8xf32>
    %32 = tpu.matmul %29, %31, %cst_31 {dimension_numbers = #tpu.dot_dimension_numbers<[1], [0], [0], [1], [0, 0, 1, 1], [], []>} : vector<3x8xbf16>, vector<8x8xbf16>, vector<3x8xf32> -> vector<3x8xf32>
    %33 = arith.addf %27, %32 : vector<3x8xf32>
    %34 = arith.truncf %33 : vector<3x8xf32> to vector<3x8xbf16>
    %c0_32 = arith.constant 0 : index
    %c0_33 = arith.constant 0 : index
    %35 = vector.load %arg4[%c0_32, %c0_33] : memref<8x16xbf16, #tpu.memory_space<vmem>>, vector<8x16xbf16>
    %cst_34 = arith.constant dense<0.000000e+00> : vector<3x16xf32>
    %36 = tpu.matmul %34, %35, %cst_34 {dimension_numbers = #tpu.dot_dimension_numbers<[1], [0], [0], [1], [0, 0, 1, 1], [], []>} : vector<3x8xbf16>, vector<8x16xbf16>, vector<3x16xf32> -> vector<3x16xf32>
    %c0_35 = arith.constant 0 : index
    %c0_36 = arith.constant 0 : index
    %37 = vector.load %arg5[%c0_35, %c0_36] : memref<1x16xf32, #tpu.memory_space<vmem>>, vector<1x16xf32>
    %38 = vector.broadcast %37 : vector<1x16xf32> to vector<3x16xf32>
    %39 = arith.addf %36, %38 : vector<3x16xf32>
    %40 = arith.mulf %39, %39 : vector<3x16xf32>
    %41 = arith.mulf %39, %40 : vector<3x16xf32>
    %cst_37 = arith.constant 4.471500e-02 : f32
    %42 = vector.broadcast %cst_37 : f32 to vector<3x16xf32>
    %43 = arith.mulf %42, %41 : vector<3x16xf32>
    %44 = arith.addf %39, %43 : vector<3x16xf32>
    %cst_38 = arith.constant 0.797884583 : f32
    %45 = vector.broadcast %cst_38 : f32 to vector<3x16xf32>
    %46 = arith.mulf %45, %44 : vector<3x16xf32>
    %47 = math.tanh %46 : vector<3x16xf32>
    %cst_39 = arith.constant 1.000000e+00 : f32
    %48 = vector.broadcast %cst_39 : f32 to vector<3x16xf32>
    %49 = arith.addf %48, %47 : vector<3x16xf32>
    %cst_40 = arith.constant 5.000000e-01 : f32
    %50 = vector.broadcast %cst_40 : f32 to vector<3x16xf32>
    %51 = arith.mulf %50, %49 : vector<3x16xf32>
    %52 = arith.mulf %39, %51 : vector<3x16xf32>
    %53 = arith.truncf %52 : vector<3x16xf32> to vector<3x16xbf16>
    %c0_41 = arith.constant 0 : index
    %c0_42 = arith.constant 0 : index
    %54 = vector.load %arg6[%c0_41, %c0_42] : memref<16x8xbf16, #tpu.memory_space<vmem>>, vector<16x8xbf16>
    %cst_43 = arith.constant dense<0.000000e+00> : vector<3x8xf32>
    %55 = tpu.matmul %53, %54, %cst_43 {dimension_numbers = #tpu.dot_dimension_numbers<[1], [0], [0], [1], [0, 0, 1, 1], [], []>} : vector<3x16xbf16>, vector<16x8xbf16>, vector<3x8xf32> -> vector<3x8xf32>
    %c0_44 = arith.constant 0 : index
    %c0_45 = arith.constant 0 : index
    %56 = vector.load %arg7[%c0_44, %c0_45] : memref<1x8xf32, #tpu.memory_space<vmem>>, vector<1x8xf32>
    %57 = vector.broadcast %56 : vector<1x8xf32> to vector<3x8xf32>
    %58 = arith.addf %55, %57 : vector<3x8xf32>
    %c0_46 = arith.constant 0 : index
    %c2_47 = arith.constant 2 : index
    %c0_48 = arith.constant 0 : index
    %59 = vector.load %arg1[%c0_46, %c2_47, %c0_48] : memref<1x7x8xbf16, #tpu.memory_space<vmem>>, vector<1x3x8xbf16>
    %60 = vector.shape_cast %59 : vector<1x3x8xbf16> to vector<3x8xbf16>
    %61 = arith.extf %60 : vector<3x8xbf16> to vector<3x8xf32>
    %62 = arith.addf %61, %58 : vector<3x8xf32>
    %63 = arith.truncf %62 : vector<3x8xf32> to vector<3x8xbf16>
    %cst_49 = arith.constant 0.000000e+00 : bf16
    %64 = vector.broadcast %cst_49 : bf16 to vector<2x8xbf16>
    %c0_50 = arith.constant 0 : index
    %c0_51 = arith.constant 0 : index
    %c0_52 = arith.constant 0 : index
    %65 = vector.load %arg8[%c0_50, %c0_51, %c0_52] : memref<1x7x8xbf16, #tpu.memory_space<vmem>>, vector<1x2x8xbf16>
    %66 = vector.shape_cast %65 : vector<1x2x8xbf16> to vector<2x8xbf16>
    %67 = vector.shape_cast %64 : vector<2x8xbf16> to vector<1x2x8xbf16>
    tpu.vector_store %arg8[%c0_50, %c0_51, %c0_52], %67 {strides = array<i32>} : memref<1x7x8xbf16, #tpu.memory_space<vmem>>, vector<1x2x8xbf16>,
    %c0_53 = arith.constant 0 : index
    %c5 = arith.constant 5 : index
    %c0_54 = arith.constant 0 : index
    %68 = vector.load %arg8[%c0_53, %c5, %c0_54] : memref<1x7x8xbf16, #tpu.memory_space<vmem>>, vector<1x2x8xbf16>
    %69 = vector.shape_cast %68 : vector<1x2x8xbf16> to vector<2x8xbf16>
    %70 = vector.shape_cast %64 : vector<2x8xbf16> to vector<1x2x8xbf16>
    tpu.vector_store %arg8[%c0_53, %c5, %c0_54], %70 {strides = array<i32>} : memref<1x7x8xbf16, #tpu.memory_space<vmem>>, vector<1x2x8xbf16>,
    %c0_55 = arith.constant 0 : index
    %c2_56 = arith.constant 2 : index
    %c0_57 = arith.constant 0 : index
    %71 = vector.load %arg8[%c0_55, %c2_56, %c0_57] : memref<1x7x8xbf16, #tpu.memory_space<vmem>>, vector<1x3x8xbf16>
    %72 = vector.shape_cast %71 : vector<1x3x8xbf16> to vector<3x8xbf16>
    %73 = vector.shape_cast %63 : vector<3x8xbf16> to vector<1x3x8xbf16>
    tpu.vector_store %arg8[%c0_55, %c2_56, %c0_57], %73 {strides = array<i32>} : memref<1x7x8xbf16, #tpu.memory_space<vmem>>, vector<1x3x8xbf16>,
    return
  }
  func.func @transform_0(%arg0: i32) -> (i32, i32, i32) {
    %c0_i32 = arith.constant 0 : i32
    %c0_i32_0 = arith.constant 0 : i32
    %c0_i32_1 = arith.constant 0 : i32
    return %arg0, %c0_i32, %c0_i32_0 : i32, i32, i32
  }
  func.func @transform_1(%arg0: i32) -> (i32, i32, i32) {
    %c0_i32 = arith.constant 0 : i32
    %c0_i32_0 = arith.constant 0 : i32
    %c0_i32_1 = arith.constant 0 : i32
    %c0_i32_2 = arith.constant 0 : i32
    return %c0_i32, %c0_i32_0, %c0_i32_1 : i32, i32, i32
  }
  func.func @transform_2(%arg0: i32) -> (i32, i32) {
    %c0_i32 = arith.constant 0 : i32
    %c0_i32_0 = arith.constant 0 : i32
    %c0_i32_1 = arith.constant 0 : i32
    return %c0_i32, %c0_i32_0 : i32, i32
  }
  func.func @transform_3(%arg0: i32) -> (i32, i32) {
    %c0_i32 = arith.constant 0 : i32
    %c0_i32_0 = arith.constant 0 : i32
    %c0_i32_1 = arith.constant 0 : i32
    return %c0_i32, %c0_i32_0 : i32, i32
  }
  func.func @transform_4(%arg0: i32) -> (i32, i32) {
    %c0_i32 = arith.constant 0 : i32
    %c0_i32_0 = arith.constant 0 : i32
    %c0_i32_1 = arith.constant 0 : i32
    return %c0_i32, %c0_i32_0 : i32, i32
  }
  func.func @transform_5(%arg0: i32) -> (i32, i32) {
    %c0_i32 = arith.constant 0 : i32
    %c0_i32_0 = arith.constant 0 : i32
    %c0_i32_1 = arith.constant 0 : i32
    return %c0_i32, %c0_i32_0 : i32, i32
  }
  func.func @transform_6(%arg0: i32) -> (i32, i32) {
    %c0_i32 = arith.constant 0 : i32
    %c0_i32_0 = arith.constant 0 : i32
    %c0_i32_1 = arith.constant 0 : i32
    return %c0_i32, %c0_i32_0 : i32, i32
  }
  func.func @transform_7(%arg0: i32) -> (i32, i32, i32) {
    %c0_i32 = arith.constant 0 : i32
    %c0_i32_0 = arith.constant 0 : i32
    %c0_i32_1 = arith.constant 0 : i32
    return %arg0, %c0_i32, %c0_i32_0 : i32, i32, i32
  }
}

module attributes {stable_mosaic.version = 11 : i64} {
  func.func @_mm_kernel(%arg0: i32, %arg1: i32, %arg2: i32, %arg3: memref<6x8xbf16, #tpu.memory_space<vmem>>, %arg4: memref<8x16xbf16, #tpu.memory_space<vmem>>, %arg5: memref<1x16xf32, #tpu.memory_space<vmem>>, %arg6: memref<6x16xbf16, #tpu.memory_space<vmem>>, %arg7: memref<6x16xf32, #tpu.memory_space<vmem>>) attributes {dimension_semantics = [#tpu.dimension_semantics<parallel>, #tpu.dimension_semantics<parallel>, #tpu.dimension_semantics<arbitrary>], iteration_bounds = array<i64: 1, 1, 1>, scalar_prefetch = 0 : i64, scratch_operands = 1 : i64, tpu.core_type = #tpu.core_type<tc>, window_params = [{transform_indices = @transform_0, window_bounds = array<i64: 6, 8>}, {transform_indices = @transform_1, window_bounds = array<i64: 8, 16>}, {transform_indices = @transform_2, window_bounds = array<i64: 1, 16>}, {transform_indices = @transform_3, window_bounds = array<i64: 6, 16>}]} {
    %c0_i32 = arith.constant 0 : i32
    %0 = arith.cmpi eq, %arg2, %c0_i32 : i32
    %1 = arith.extui %0 : i1 to i32
    %c0_i32_0 = arith.constant 0 : i32
    %2 = arith.cmpi ne, %1, %c0_i32_0 : i32
    scf.if %2 {
      %cst_10 = arith.constant 0.000000e+00 : f32
      %12 = vector.broadcast %cst_10 : f32 to vector<6x16xf32>
      %c0_11 = arith.constant 0 : index
      %c0_12 = arith.constant 0 : index
      %13 = vector.load %arg7[%c0_11, %c0_12] : memref<6x16xf32, #tpu.memory_space<vmem>>, vector<6x16xf32>
      tpu.vector_store %arg7[%c0_11, %c0_12], %12 {strides = array<i32>} : memref<6x16xf32, #tpu.memory_space<vmem>>, vector<6x16xf32>,
    } else {
    }
    %c0 = arith.constant 0 : index
    %c0_1 = arith.constant 0 : index
    %3 = vector.load %arg7[%c0, %c0_1] : memref<6x16xf32, #tpu.memory_space<vmem>>, vector<6x16xf32>
    %c0_2 = arith.constant 0 : index
    %c0_3 = arith.constant 0 : index
    %4 = vector.load %arg3[%c0_2, %c0_3] : memref<6x8xbf16, #tpu.memory_space<vmem>>, vector<6x8xbf16>
    %c0_4 = arith.constant 0 : index
    %c0_5 = arith.constant 0 : index
    %5 = vector.load %arg4[%c0_4, %c0_5] : memref<8x16xbf16, #tpu.memory_space<vmem>>, vector<8x16xbf16>
    %cst = arith.constant dense<0.000000e+00> : vector<6x16xf32>
    %6 = tpu.matmul %4, %5, %cst {dimension_numbers = #tpu.dot_dimension_numbers<[1], [0], [0], [1], [0, 0, 1, 1], [], []>} : vector<6x8xbf16>, vector<8x16xbf16>, vector<6x16xf32> -> vector<6x16xf32>
    %7 = arith.addf %3, %6 : vector<6x16xf32>
    %c0_6 = arith.constant 0 : index
    %c0_7 = arith.constant 0 : index
    %8 = vector.load %arg7[%c0_6, %c0_7] : memref<6x16xf32, #tpu.memory_space<vmem>>, vector<6x16xf32>
    tpu.vector_store %arg7[%c0_6, %c0_7], %7 {strides = array<i32>} : memref<6x16xf32, #tpu.memory_space<vmem>>, vector<6x16xf32>,
    %c0_i32_8 = arith.constant 0 : i32
    %9 = arith.cmpi eq, %arg2, %c0_i32_8 : i32
    %10 = arith.extui %9 : i1 to i32
    %c0_i32_9 = arith.constant 0 : i32
    %11 = arith.cmpi ne, %10, %c0_i32_9 : i32
    scf.if %11 {
      %c0_10 = arith.constant 0 : index
      %c0_11 = arith.constant 0 : index
      %12 = vector.load %arg7[%c0_10, %c0_11] : memref<6x16xf32, #tpu.memory_space<vmem>>, vector<6x16xf32>
      %c0_12 = arith.constant 0 : index
      %c0_13 = arith.constant 0 : index
      %13 = vector.load %arg5[%c0_12, %c0_13] : memref<1x16xf32, #tpu.memory_space<vmem>>, vector<1x16xf32>
      %14 = vector.broadcast %13 : vector<1x16xf32> to vector<6x16xf32>
      %15 = arith.addf %12, %14 : vector<6x16xf32>
      %16 = arith.mulf %15, %15 : vector<6x16xf32>
      %17 = arith.mulf %15, %16 : vector<6x16xf32>
      %cst_14 = arith.constant 4.471500e-02 : f32
      %18 = vector.broadcast %cst_14 : f32 to vector<6x16xf32>
      %19 = arith.mulf %18, %17 : vector<6x16xf32>
      %20 = arith.addf %15, %19 : vector<6x16xf32>
      %cst_15 = arith.constant 0.797884583 : f32
      %21 = vector.broadcast %cst_15 : f32 to vector<6x16xf32>
      %22 = arith.mulf %21, %20 : vector<6x16xf32>
      %23 = math.tanh %22 : vector<6x16xf32>
      %cst_16 = arith.constant 1.000000e+00 : f32
      %24 = vector.broadcast %cst_16 : f32 to vector<6x16xf32>
      %25 = arith.addf %24, %23 : vector<6x16xf32>
      %cst_17 = arith.constant 5.000000e-01 : f32
      %26 = vector.broadcast %cst_17 : f32 to vector<6x16xf32>
      %27 = arith.mulf %26, %25 : vector<6x16xf32>
      %28 = arith.mulf %15, %27 : vector<6x16xf32>
      %29 = arith.truncf %28 : vector<6x16xf32> to vector<6x16xbf16>
      %c0_18 = arith.constant 0 : index
      %c0_19 = arith.constant 0 : index
      %30 = vector.load %arg6[%c0_18, %c0_19] : memref<6x16xbf16, #tpu.memory_space<vmem>>, vector<6x16xbf16>
      tpu.vector_store %arg6[%c0_18, %c0_19], %29 {strides = array<i32>} : memref<6x16xbf16, #tpu.memory_space<vmem>>, vector<6x16xbf16>,
    } else {
    }
    return
  }
  func.func @transform_0(%arg0: i32, %arg1: i32, %arg2: i32) -> (i32, i32) {
    %c0_i32 = arith.constant 0 : i32
    return %arg0, %arg2 : i32, i32
  }
  func.func @transform_1(%arg0: i32, %arg1: i32, %arg2: i32) -> (i32, i32) {
    %c0_i32 = arith.constant 0 : i32
    return %arg2, %arg1 : i32, i32
  }
  func.func @transform_2(%arg0: i32, %arg1: i32, %arg2: i32) -> (i32, i32) {
    %c0_i32 = arith.constant 0 : i32
    %c0_i32_0 = arith.constant 0 : i32
    return %c0_i32, %arg1 : i32, i32
  }
  func.func @transform_3(%arg0: i32, %arg1: i32, %arg2: i32) -> (i32, i32) {
    %c0_i32 = arith.constant 0 : i32
    return %arg0, %arg1 : i32, i32
  }
}

module attributes {stable_mosaic.version = 11 : i64} {
  func.func @_mm_kernel(%arg0: i32, %arg1: i32, %arg2: i32, %arg3: memref<6x16xbf16, #tpu.memory_space<vmem>>, %arg4: memref<16x32xbf16, #tpu.memory_space<vmem>>, %arg5: memref<1x32xf32, #tpu.memory_space<vmem>>, %arg6: memref<6x32xf32, #tpu.memory_space<vmem>>, %arg7: memref<6x32xf32, #tpu.memory_space<vmem>>) attributes {dimension_semantics = [#tpu.dimension_semantics<parallel>, #tpu.dimension_semantics<parallel>, #tpu.dimension_semantics<arbitrary>], iteration_bounds = array<i64: 1, 1, 1>, scalar_prefetch = 0 : i64, scratch_operands = 1 : i64, tpu.core_type = #tpu.core_type<tc>, window_params = [{transform_indices = @transform_0, window_bounds = array<i64: 6, 16>}, {transform_indices = @transform_1, window_bounds = array<i64: 16, 32>}, {transform_indices = @transform_2, window_bounds = array<i64: 1, 32>}, {transform_indices = @transform_3, window_bounds = array<i64: 6, 32>}]} {
    %c0_i32 = arith.constant 0 : i32
    %0 = arith.cmpi eq, %arg2, %c0_i32 : i32
    %1 = arith.extui %0 : i1 to i32
    %c0_i32_0 = arith.constant 0 : i32
    %2 = arith.cmpi ne, %1, %c0_i32_0 : i32
    scf.if %2 {
      %cst_10 = arith.constant 0.000000e+00 : f32
      %12 = vector.broadcast %cst_10 : f32 to vector<6x32xf32>
      %c0_11 = arith.constant 0 : index
      %c0_12 = arith.constant 0 : index
      %13 = vector.load %arg7[%c0_11, %c0_12] : memref<6x32xf32, #tpu.memory_space<vmem>>, vector<6x32xf32>
      tpu.vector_store %arg7[%c0_11, %c0_12], %12 {strides = array<i32>} : memref<6x32xf32, #tpu.memory_space<vmem>>, vector<6x32xf32>,
    } else {
    }
    %c0 = arith.constant 0 : index
    %c0_1 = arith.constant 0 : index
    %3 = vector.load %arg7[%c0, %c0_1] : memref<6x32xf32, #tpu.memory_space<vmem>>, vector<6x32xf32>
    %c0_2 = arith.constant 0 : index
    %c0_3 = arith.constant 0 : index
    %4 = vector.load %arg3[%c0_2, %c0_3] : memref<6x16xbf16, #tpu.memory_space<vmem>>, vector<6x16xbf16>
    %c0_4 = arith.constant 0 : index
    %c0_5 = arith.constant 0 : index
    %5 = vector.load %arg4[%c0_4, %c0_5] : memref<16x32xbf16, #tpu.memory_space<vmem>>, vector<16x32xbf16>
    %cst = arith.constant dense<0.000000e+00> : vector<6x32xf32>
    %6 = tpu.matmul %4, %5, %cst {dimension_numbers = #tpu.dot_dimension_numbers<[1], [0], [0], [1], [0, 0, 1, 1], [], []>} : vector<6x16xbf16>, vector<16x32xbf16>, vector<6x32xf32> -> vector<6x32xf32>
    %7 = arith.addf %3, %6 : vector<6x32xf32>
    %c0_6 = arith.constant 0 : index
    %c0_7 = arith.constant 0 : index
    %8 = vector.load %arg7[%c0_6, %c0_7] : memref<6x32xf32, #tpu.memory_space<vmem>>, vector<6x32xf32>
    tpu.vector_store %arg7[%c0_6, %c0_7], %7 {strides = array<i32>} : memref<6x32xf32, #tpu.memory_space<vmem>>, vector<6x32xf32>,
    %c0_i32_8 = arith.constant 0 : i32
    %9 = arith.cmpi eq, %arg2, %c0_i32_8 : i32
    %10 = arith.extui %9 : i1 to i32
    %c0_i32_9 = arith.constant 0 : i32
    %11 = arith.cmpi ne, %10, %c0_i32_9 : i32
    scf.if %11 {
      %c0_10 = arith.constant 0 : index
      %c0_11 = arith.constant 0 : index
      %12 = vector.load %arg7[%c0_10, %c0_11] : memref<6x32xf32, #tpu.memory_space<vmem>>, vector<6x32xf32>
      %c0_12 = arith.constant 0 : index
      %c0_13 = arith.constant 0 : index
      %13 = vector.load %arg5[%c0_12, %c0_13] : memref<1x32xf32, #tpu.memory_space<vmem>>, vector<1x32xf32>
      %14 = vector.broadcast %13 : vector<1x32xf32> to vector<6x32xf32>
      %15 = arith.addf %12, %14 : vector<6x32xf32>
      %c0_14 = arith.constant 0 : index
      %c0_15 = arith.constant 0 : index
      %16 = vector.load %arg6[%c0_14, %c0_15] : memref<6x32xf32, #tpu.memory_space<vmem>>, vector<6x32xf32>
      tpu.vector_store %arg6[%c0_14, %c0_15], %15 {strides = array<i32>} : memref<6x32xf32, #tpu.memory_space<vmem>>, vector<6x32xf32>,
    } else {
    }
    return
  }
  func.func @transform_0(%arg0: i32, %arg1: i32, %arg2: i32) -> (i32, i32) {
    %c0_i32 = arith.constant 0 : i32
    return %arg0, %arg2 : i32, i32
  }
  func.func @transform_1(%arg0: i32, %arg1: i32, %arg2: i32) -> (i32, i32) {
    %c0_i32 = arith.constant 0 : i32
    return %arg2, %arg1 : i32, i32
  }
  func.func @transform_2(%arg0: i32, %arg1: i32, %arg2: i32) -> (i32, i32) {
    %c0_i32 = arith.constant 0 : i32
    %c0_i32_0 = arith.constant 0 : i32
    return %c0_i32, %arg1 : i32, i32
  }
  func.func @transform_3(%arg0: i32, %arg1: i32, %arg2: i32) -> (i32, i32) {
    %c0_i32 = arith.constant 0 : i32
    return %arg0, %arg1 : i32, i32
  }
}

</mosaic_0001>

<bundles_post_ra>
// kernel: tpu_custom_call.1
= control target key start
LH: loop header
LB: loop body
LE: loop exit
PB: predicated region body
PF: predicated region fallthrough
CT: control target
= control target key end

     0   :  { %6 = vsyncpa [#allocation3], 0  ;;  %s157_s0 = inlined_call_operand.hbm [shape: f32[8,128], index: 0, kind: input, shape index: {}]   ;;  %s158_s1 = inlined_call_operand.hbm [shape: f32[8,128], index: 1, kind: output, shape index: {}]  }
   0x1   :  { %7 = vsyncpa [#allocation4], 0  ;;  %s13_s8 = sshll.u32 %s157_s0, 4  ;;  %s139_s9 = smov [#allocation2]   ;;  %s14_s8 = int_to_ptr.hbm [resolvable:$true] %s13_s8 }
   0x2   :  { %s15_s10 = sshll.u32 %s139_s9, 4  ;;  %s16_s10 = int_to_ptr.vmem [resolvable:$true] %s15_s10 }
   0x3   :  { %18 = dma.hbm_to_vmem [thread:$0]  %s14_s8, 128, %s16_s10, [#allocation3]  }
   0x4   :  { %135 = dma.done.wait [#allocation3], 128  }
   0x5   :  { %136 = vsyncadd [#allocation3], 4294967168  ;;  %v23_v0 = vld [vmem:[#allocation2] sm:$0xff]  ;;  %s140_s0 = smov [#allocation5]   ;;  %s72_s14 = sshll.u32 %s158_s1, 4  ;;  %s73_s14 = int_to_ptr.hbm [resolvable:$true] %s72_s14 }
   0x6   :  { %v24_v1 = vmul.f32 %v23_v0, %v23_v0  ;;  %s70_s11 = sshll.u32 %s140_s0, 4  ;;  %s71_s11 = int_to_ptr.vmem [resolvable:$true] %s70_s11 }
   0x8   :  { %v25_v2 = vmin.f32 %v24_v1, 16.0 }
   0xa   :  { %v26_v3 = vmul.f32 2.1237322e-06, %v25_v2  ;;  %v37_v4 = vmul.f32 3.8918573e-05, %v25_v2 }
   0xc   :  { %v27_v5 = vadd.f32 0.00028619796, %v26_v3  ;;  %v38_v6 = vadd.f32 0.001143296, %v37_v4 }
   0xe   :  { %v28_v7 = vmul.f32 %v27_v5, %v25_v2  ;;  %v39_v8 = vmul.f32 %v38_v6, %v25_v2 }
  0x10   :  { %v29_v9 = vadd.f32 0.0036580483, %v28_v7  ;;  %v40_v10 = vadd.f32 0.014752088, %v39_v8 }
  0x12   :  { %v30_v11 = vmul.f32 %v29_v9, %v25_v2  ;;  %v41_v12 = vmul.f32 %v40_v10, %v25_v2 }
  0x14   :  { %v42_v13 = vadd.f32 0.112945676, %v41_v12  ;;  %v31_v14 = vadd.f32 0.05243302, %v30_v11 }
  0x16   :  { %v43_v15 = vmul.f32 %v42_v13, %v25_v2  ;;  %v32_v17 = vmul.f32 %v31_v14, %v25_v2 }
  0x18   :  { %v44_v16 = vadd.f32 0.4994258, %v43_v15  ;;  %v33_v20 = vadd.f32 0.18741608, %v32_v17 }
  0x1a   :  { %v45_v18 = vmul.f32 %v44_v16, %v25_v2  ;;  %v34_v21 = vmul.f32 %v33_v20, %v25_v2 }
  0x1c   :  { %v46_v19 = vadd.f32 1.0, %v45_v18  ;;  %v35_v24 = vadd.f32 1.1283791, %v34_v21 }
  0x1e   :  { %85 = vrcp.f32 %v46_v19  ;;  %v58_v25 = vand.u32 2147483648, %v46_v19  ;;  %vm52_vm0 = vweird.f32 %v46_v19  ;;  %v56_v27 = vand.u32 2147483647, %v46_v19 }
  0x1f   :  { %v36_v30 = vmul.f32 %v35_v24, %v23_v0 }
  0x20   :  { %v59_v29 = vor.u32 1.1754944e-38, %v58_v25  ;;  %vm57_vm3 = vcmp.eq.f32.partialorder %v56_v27, 8.507059e+37 }
  0x24   :  { %v86_v22 = vpop.eup %85 }
  0x25   :  { %v48_v23 = vmul.f32 %v86_v22, %v46_v19  ;;  %vm53_vm1 = vweird.f32 %v86_v22 }
  0x26   :  { %vm54_vm2 = vmor %vm52_vm0, %vm53_vm1 }
  0x27   :  { %v49_v26 = vsub.f32 1.0, %v48_v23 }
  0x29   :  { %v50_v28 = vmul.f32 %v86_v22, %v49_v26 }
  0x2b   :  { %v51_v31 = vadd.f32 %v86_v22, %v50_v28 }
  0x2d   :  { %v55_v32 = vsel %vm54_vm2, %v86_v22, %v51_v31 }
  0x2e   :  { %v60_v33 = vsel %vm57_vm3, %v59_v29, %v55_v32 }
  0x2f   :  { %v61_v34 = vmul.f32 %v60_v33, %v36_v30 }
  0x31   :  { %v82_v35 = vclamps-f32 %v61_v34, 1.0 }
  0x33   :  { %64 = vst [vmem:[#allocation5] sm:$0xff] %v82_v35 }
  0x34   :  { %75 = dma.vmem_to_hbm [thread:$0]  %s71_s11, 128, %s73_s14, [#allocation4]  }
  0x35   :  { %137 = dma.done.wait [#allocation4], 128  }
  0x36   :  { %138 = vsyncadd [#allocation4], 4294967168 }
  0x37   :  { %80 = vsyncpa [#allocation3], 1 }
  0x38   :  { %81 = vsyncpa [#allocation4], 1 }

// kernel: _lambda_.5
= control target key start
LH: loop header
LB: loop body
LE: loop exit
PB: predicated region body
PF: predicated region fallthrough
CT: control target
= control target key end

     0   :  { %s366_s12 = smov 0   ;;  %s394_s0 = inlined_call_operand.vmem [shape: bf16[2,4,16], index: 0, kind: input, shape index: {}]   ;;  %s395_s1 = inlined_call_operand.vmem [shape: bf16[2,16,8], index: 1, kind: input, shape index: {}]   ;;  %s396_s2 = inlined_call_operand.vmem [shape: f32[1,8], index: 2, kind: input, shape index: {}]   ;;  %s397_s3 = inlined_call_operand.vmem [shape: bf16[2,7,8], index: 3, kind: output, shape index: {}]  }
   0x1 LB: > { %s304_s13 = sadd.s32 4294967295, %s343_s12   ;;  %p308_p0 = scmp.ge.s32.totalorder %s343_s12, 1  ;;  %s343_s12 = sphi %s366_s12, %s13_s12  }
   0x2   : > { %p136_p1 = scmp.lt.s32.totalorder %s343_s12, 3 }
   0x4   : > { %p137_p2 = pnand %p308_p0, %p136_p1 }
   0x5   : > { %p158_p3 = scmp.lt.s32.totalorder (!%p137_p2), %s304_s13, 1 }
   0x6   : > { %140 = sbr.rel (%p137_p2) target bundleno = 163 (0xa3), region = 32 }
   0xb   : > { %v325_v0 = vld [vmem:[%s395_s1] sm:$0xff]  ;;  %vm236_vm0 = vcmask 60418   ;;  %vm237_vm1 = vsmask.f32 3338  ;;  %v326_v1 = vld [vmem:[%s395_s1 + $0x8] sm:$0xff]  ;;  %s399_s13 = smov (!%p158_p3, %s304_s13), 1 }
   0xc   : > { %192 = vmatpush.bf16.msra.mxu0 %v325_v0  ;;  %vm234_vm2 = vcmask 57344   ;;  %226 = vmatpush.bf16.msra.mxu1 %v326_v1  ;;  %s309_s18 = sshll.u32 %s399_s13, 1  ;;  %s310_s19 = sshll.u32 %s399_s13, 2  ;;  %vm181_vm3 = vcmask 130048   ;;  %vm238_vm4 = vmand %vm236_vm0, %vm237_vm1  ;;  %v345_v3 = vmov 0   ;;  %vm245_vm5 = vcmask 59393  }
   0xd   : > { %s161_s22 = scalar_lea.vmem %s394_s0, %s309_s18  ;;  %s165_s25 = scalar_lea.vmem %s397_s3, %s310_s19  ;;  %v336_v12 = vld [vmem:[%s396_s2] ss:$0 sm:$0xff]  ;;  %vm246_vm6 = vsmask.f32 2304 }
   0xe   : > { %v172_v2 = vld [vmem:[%s161_s22] sm:$0x3]  ;;  %235 = vst.msk [vmem:[%s165_s25] sm:$0x1] %vm234_vm2, %v345_v3  ;;  %v239_v4 = vld [vmem:[%s165_s25] sm:$0xc]  ;;  %vm247_vm7 = vmand %vm245_vm5, %vm246_vm6 }
   0xf   : > { %315 = vmatmul.msk.bf16.vlgmr.msra.gmra.mxu0 %vm181_vm3, %v172_v2  ;;  %202 = vst [vmem:[#allocation1] ss:$4 sm:$0xff] %v172_v2  ;;  %v240_v5 = vsel %vm238_vm4, 0, %v239_v4 }
  0x10   : > { %241 = vst [vmem:[%s165_s25] sm:$0xc] %v240_v5 }
  0x16   : > { %v203_v6 = vld.sshfl [vmem:[#allocation1] sm:$0xff pattern:$0x73625140] }
  0x17   : > { %v204_v7 = vshrl.u32 %v203_v6, 16  ;;  %v206_v8 = vshll.u32 %v203_v6, 16  ;;  %v248_v18 = vld [vmem:[%s165_s25] sm:$0x6] }
  0x19   : > { %v208_v9 = vrot.slane %v206_v8, 1 }
  0x1b   : > { %v209_v10 = vor.u32 %v208_v9, %v204_v7 }
  0x1d   : > { %322 = vmatmul.msk.bf16.vlgmr.msra.gmra.mxu1 %vm181_vm3, %v209_v10 }
  0x8c   : > { %v194_v11 = vpop.f32.mrf.mxu0 }
  0x8d   : > { %v198_v14 = vadd.f32 %v336_v12, %v194_v11 }
  0x94   : > { %v196_v13 = vpop.f32.mrf.mxu0 }
  0x9a   : > { %v228_v15 = vpop.f32.mrf.mxu1 }
  0x9b   : > { %v232_v16 = vadd.f32 %v228_v15, %v198_v14 }
  0x9d   : > { %v233_v17 = vpack.c.bf16 %v232_v16, %v232_v16 }
  0x9f   : > { %v243_v19 = vrot.slane %v233_v17, 7 }
  0xa1   : > { %v249_v20 = vsel %vm247_vm7, %v243_v19, %v248_v18 }
  0xa2   : > { %250 = vst [vmem:[%s165_s25] sm:$0x6] %v249_v20  ;;  %v230_v21 = vpop.f32.mrf.mxu1 }
  0xa3 PF: > { %s13_s12 = sadd.s32 1, %s343_s12  }
  0xa4   : > { %p10_p4 = scmp.ge.s32.totalorder %s13_s12, 4  }
  0xa6   :  { %12 = sbr.rel (!%p10_p4) target bundleno = 1 (0x1), region = 63 }

// kernel: _lambda_.7
= control target key start
LH: loop header
LB: loop body
LE: loop exit
PB: predicated region body
PF: predicated region fallthrough
CT: control target
= control target key end

     0   :  { %s660_s24 = smov 0   ;;  %s727_s0 = inlined_call_operand.vmem [shape: bf16[2,7,8], index: 0, kind: input, shape index: {}]   ;;  %s728_s1 = inlined_call_operand.vmem [shape: bf16[5,8,8], index: 1, kind: input, shape index: {}]   ;;  %s729_s2 = inlined_call_operand.vmem [shape: f32[1,8], index: 2, kind: input, shape index: {}]   ;;  %s730_s3 = inlined_call_operand.vmem [shape: bf16[8,16], index: 3, kind: input, shape index: {}]   ;;  %s731_s4 = inlined_call_operand.vmem [shape: f32[1,16], index: 4, kind: input, shape index: {}]   ;;  %s732_s5 = inlined_call_operand.vmem [shape: bf16[16,8], index: 5, kind: input, shape index: {}]   ;;  %s733_s6 = inlined_call_operand.vmem [shape: f32[1,8], index: 6, kind: input, shape index: {}]   ;;  %s734_s7 = inlined_call_operand.vmem [shape: bf16[2,3,8], index: 7, kind: output, shape index: {}]  }
   0x1 LB: > { %s572_s25 = sadd.s32 4294967295, %s618_s24   ;;  %p576_p0 = scmp.ge.s32.totalorder %s618_s24, 1  ;;  %s618_s24 = sphi %s660_s24, %s17_s24  }
   0x2   : > { %p236_p1 = scmp.lt.s32.totalorder %s618_s24, 3 }
   0x4   : > { %p237_p2 = pnand %p576_p0, %p236_p1 }
   0x5   : > { %p266_p3 = scmp.lt.s32.totalorder (!%p237_p2), %s572_s25, 1 }
   0x6   : > { %240 = sbr.rel (%p237_p2) target bundleno = 466 (0x1d2), region = 48 }
   0xb   : > { %v281_v0 = vld [vmem:[%s728_s1] sm:$0xf]  ;;  %vm286_vm0 = vcmask 1043456   ;;  %v586_v2 = vld [vmem:[%s728_s1 + $0x10] sm:$0xf]  ;;  %s736_s25 = smov (!%p266_p3, %s572_s25), 1 }
   0xc   : > { %v288_v1 = vsel %vm286_vm0, %v281_v0, 0  ;;  %v582_v3 = vld [vmem:[%s728_s1 + $0x8] sm:$0xf]  ;;  %v404_v4 = vsel %vm286_vm0, %v586_v2, 0  ;;  %v580_v6 = vld [vmem:[%s728_s1 + $0x4] sm:$0xf] }
   0xd   : > { %297 = vmatpush.bf16.msra.mxu0 %v288_v1  ;;  %v347_v5 = vsel %vm286_vm0, %v582_v3, 0  ;;  %v320_v7 = vsel %vm286_vm0, %v580_v6, 0  ;;  %v584_v8 = vld [vmem:[%s728_s1 + $0xc] sm:$0xf]  ;;  %s577_s13 = sshll.u32 %s736_s25, 2  ;;  %vm282_vm1 = vcmask 64512  }
   0xe   : > { %356 = vmatpush.bf16.msra.mxu2 %v347_v5  ;;  %329 = vmatpush.bf16.msra.mxu1 %v320_v7  ;;  %v377_v9 = vsel %vm286_vm0, %v584_v8, 0  ;;  %s269_s16 = scalar_lea.vmem %s727_s0, %s577_s13  ;;  %v421_v30 = vld [vmem:[%s730_s3] sm:$0xf]  ;;  %vm467_vm2 = vcmask 130048   ;;  %vm501_vm3 = vcmask 1040384   ;;  %vm502_vm4 = vcmask 1042434  }
   0xf   : > { %386 = vmatpush.bf16.msra.mxu3 %v377_v9  ;;  %v280_v10 = vld [vmem:[%s269_s16] sm:$0x3]  ;;  %v393_v14 = vld [vmem:[%s269_s16] sm:$0xc]  ;;  %v430_v31 = vsel %vm286_vm0, %v421_v30, 0  ;;  %vm503_vm5 = vmor %vm501_vm3, %vm502_vm4  ;;  %vm504_vm6 = vcmask 1044484  }
  0x10   : > { %v694_v11 = vld [vmem:[%s269_s16] sm:$0x6]  ;;  %579 = vmatmul.msk.bf16.vlgmr.msra.gmra.mxu0 %vm282_vm1, %v280_v10  ;;  %v307_v12 = vunpack.c.l.b16 %v280_v10  ;;  %v397_v17 = vunpack.c.l.b16 %v393_v14  ;;  %v607_v33 = vld [vmem:[%s729_s2] ss:$0 sm:$0xff]  ;;  %s578_s29 = sshll.u32 %s736_s25, 1  ;;  %vm492_vm7 = vcmask 1041408   ;;  %vm505_vm9 = vmor %vm503_vm5, %vm504_vm6 }
  0x11   : > { %413 = vmatpush.bf16.msrb.mxu0 %v404_v4  ;;  %v340_v13 = vunpack.c.l.b16 %v694_v11  ;;  %v598_v49 = vld [vmem:[%s732_s5] sm:$0xff]  ;;  %v484_v3 = vunpack.c.l.bf16 %v694_v11  ;;  %vm497_vm8 = vcmask 1043458   ;;  %vm506_vm10 = vcmask 1046534   ;;  %s273_s9 = scalar_lea.vmem %s734_s7, %s578_s29 }
  0x12   : > { %v308_v15 = vpack.c.b16 %v307_v12, %v307_v12  ;;  %v398_v26 = vpack.c.b16 %v397_v17, %v397_v17  ;;  %439 = vmatpush.bf16.msrb.mxu1 %v430_v31  ;;  %478 = vmatpush.bf16.msrb.mxu2 %v598_v49  ;;  %v608_v50 = vld [vmem:[%s731_s4] ss:$0 sm:$0xff]  ;;  %vm513_vm11 = vcmask 58368   ;;  %vm514_vm12 = vsmask.f32 1280  ;;  %vm507_vm13 = vmor %vm505_vm9, %vm506_vm10 }
  0x13   : > { %v341_v16 = vpack.c.b16 %v340_v13, %v340_v13  ;;  %v609_v0 = vld [vmem:[%s733_s6] ss:$0 sm:$0xff]  ;;  %vm515_vm14 = vmand %vm513_vm11, %vm514_vm12 }
  0x14   : > { %v310_v18 = vshrl.u32 %v308_v15, 16  ;;  %v312_v19 = vshll.u32 %v308_v15, 16  ;;  %v399_v29 = vrot.slane %v398_v26, 2  ;;  %v516_v11 = vld [vmem:[%s273_s9] sm:$0x3] }
  0x15   : > { %v342_v20 = vrot.slane %v341_v16, 1  ;;  %v366_v21 = vshrl.u32 %v341_v16, 16  ;;  %v369_v22 = vshll.u32 %v341_v16, 16 }
  0x16   : > { %v314_v23 = vrot.slane %v312_v19, 1 }
  0x17   : > { %583 = vmatmul.msk.bf16.vlgmr.msra.gmra.mxu2 %vm282_vm1, %v342_v20  ;;  %v368_v24 = vrot.slane %v366_v21, 1  ;;  %v371_v25 = vrot.slane %v369_v22, 2 }
  0x18   : > { %v315_v27 = vor.u32 %v314_v23, %v310_v18 }
  0x19   : > { %v372_v28 = vor.u32 %v371_v25, %v368_v24 }
  0x1a   : > { %581 = vmatmul.msk.bf16.vlgmr.msra.gmra.mxu1 %vm282_vm1, %v315_v27 }
  0x1b   : > { %585 = vmatmul.msk.bf16.vlgmr.msra.gmra.mxu3 %vm282_vm1, %v372_v28 }
  0x20   : > { %587 = vmatmul.msk.bf16.vlgmr.msrb.gmra.mxu0 %vm282_vm1, %v399_v29 }
  0x8d   : > { %v299_v32 = vpop.f32.mrf.mxu0 }
  0x8e   : > { %v303_v35 = vadd.f32 %v607_v33, %v299_v32 }
  0x95   : > { %v301_v34 = vpop.f32.mrf.mxu0 }
  0x97   : > { %v331_v36 = vpop.f32.mrf.mxu1 }
  0x98   : > { %v335_v37 = vadd.f32 %v331_v36, %v303_v35 }
  0x9a   : > { %v358_v38 = vpop.f32.mrf.mxu2 }
  0x9b   : > { %v362_v39 = vadd.f32 %v358_v38, %v335_v37 }
  0x9d   : > { %v415_v40 = vpop.f32.mrf.mxu0 }
  0x9e   : > { %v388_v41 = vpop.f32.mrf.mxu3 }
  0x9f   : > { %v392_v42 = vadd.f32 %v388_v41, %v362_v39  ;;  %v333_v43 = vpop.f32.mrf.mxu1 }
  0xa1   : > { %v419_v44 = vadd.f32 %v415_v40, %v392_v42 }
  0xa2   : > { %v360_v45 = vpop.f32.mrf.mxu2 }
  0xa3   : > { %v420_v46 = vpack.c.bf16 %v419_v44, %v419_v44 }
  0xa5   : > { %588 = vmatmul.msk.bf16.vlgmr.msrb.gmra.mxu1 %vm282_vm1, %v420_v46  ;;  %v417_v47 = vpop.f32.mrf.mxu0 }
  0xa6   : > { %v390_v48 = vpop.f32.mrf.mxu3 }
 0x122   : > { %v441_v51 = vpop.f32.mrf.mxu1 }
 0x123   : > { %v442_v52 = vadd.f32 %v608_v50, %v441_v51 }
 0x125   : > { %v445_v53 = vmul.f32 %v442_v52, %v442_v52 }
 0x127   : > { %v446_v54 = vmul.f32 %v445_v53, %v442_v52 }
 0x129   : > { %v447_v55 = vmul.f32 0.044715, %v446_v54 }
 0x12a   : > { %v443_v56 = vpop.f32.mrf.mxu1 }
 0x12b   : > { %v448_v57 = vadd.f32 %v447_v55, %v442_v52 }
 0x12d   : > { %v449_v58 = vmul.f32 0.7978846, %v448_v57 }
 0x12f   : > { %610 = vtanh.f32 %v449_v58 }
 0x135   : > { %v611_v59 = vpop.eup %610 }
 0x136   : > { %v451_v60 = vadd.f32 1.0, %v611_v59 }
 0x138   : > { %v452_v61 = vmul.f32 0.5, %v451_v60 }
 0x13a   : > { %v453_v62 = vmul.f32 %v452_v61, %v442_v52 }
 0x13c   : > { %v454_v63 = vpack.c.bf16 %v453_v62, %v453_v62 }
 0x13e   : > { %593 = vmatmul.msk.bf16.vlgmr.msrb.gmra.mxu2 %vm467_vm2, %v454_v63 }
 0x1c1   : > { %v480_v1 = vpop.f32.mrf.mxu2 }
 0x1c2   : > { %v481_v2 = vadd.f32 %v609_v0, %v480_v1 }
 0x1c4   : > { %v486_v4 = vrot.slane %v481_v2, 6 }
 0x1c6   : > { %v488_v5 = vadd.f32 %v486_v4, %v484_v3 }
 0x1c8   : > { %v489_v6 = vpack.c.bf16 %v488_v5, %v488_v5 }
 0x1c9   : > { %v482_v7 = vpop.f32.mrf.mxu2 }
 0x1ca   : > { %v491_v8 = vrot.slane %v489_v6, 2 }
 0x1cc   : > { %v495_v9 = vsel %vm492_vm7, %v489_v6, %v491_v8  ;;  %v498_v10 = vsel %vm497_vm8, %v489_v6, %v491_v8 }
 0x1cd   : > { %v594_v12 = vrot.slane %v495_v9, 9  ;;  %v595_v13 = vrot.slane %v498_v10, 9 }
 0x1cf   : > { %v511_v14 = vsel %vm507_vm13, %v594_v12, %v595_v13 }
 0x1d0   : > { %v517_v15 = vsel %vm515_vm14, %v511_v14, %v516_v11 }
 0x1d1   : > { %518 = vst [vmem:[%s273_s9] sm:$0x3] %v517_v15 }
 0x1d2 PF: > { %s17_s24 = sadd.s32 1, %s618_s24  }
 0x1d3   : > { %p14_p4 = scmp.ge.s32.totalorder %s17_s24, 4  }
 0x1d5   :  { %16 = sbr.rel (!%p14_p4) target bundleno = 1 (0x1), region = 82 }

// kernel: _lambda_.8
= control target key start
LH: loop header
LB: loop body
LE: loop exit
PB: predicated region body
PF: predicated region fallthrough
CT: control target
= control target key end

     0   :  { %vm28_vm0 = vcmask 1043456   ;;  %vm19_vm1 = vcmask 128000   ;;  %v78_v1 = vmov 0.0   ;;  %vm24_vm2 = vcmask 64512   ;;  %s111_s1 = inlined_call_operand.vmem [shape: bf16[8,16], index: 1, kind: input, shape index: {}]   ;;  %s112_s0 = inlined_call_operand.vmem [shape: bf16[6,8], index: 0, kind: input, shape index: {}]   ;;  %s113_s2 = inlined_call_operand.vmem [shape: f32[1,16], index: 2, kind: input, shape index: {}]   ;;  %s114_s3 = inlined_call_operand.vmem [shape: bf16[6,16], index: 3, kind: output, shape index: {}]  }
   0x1   :  { %v23_v0 = vld [vmem:[%s111_s1] sm:$0xf]  ;;  %20 = vst.msk [vmem:[#allocation2] sm:$0x3f] %vm19_vm1, %v78_v1  ;;  %vm67_vm3 = vcmask 124928  }
   0x2   :  { %v30_v2 = vsel %vm28_vm0, %v23_v0, 0  ;;  %v22_v3 = vld [vmem:[%s112_s0] sm:$0x7] }
   0x3   :  { %39 = vmatpush.bf16.msra.mxu0 %v30_v2  ;;  %v75_v7 = vld [vmem:[%s113_s2] ss:$0 sm:$0xff] }
   0x6   :  { %73 = vmatmul.msk.bf16.vlgmr.msra.gmra.mxu0 %vm24_vm2, %v22_v3 }
   0x8   :  { %v21_v4 = vld [vmem:[#allocation2] sm:$0x3f] }
  0x83   :  { %v41_v5 = vpop.f32.mrf.mxu0 }
  0x84   :  { %v45_v6 = vadd.f32 %v41_v5, %v21_v4 }
  0x86   :  { %47 = vst.msk [vmem:[#allocation2] sm:$0x3f] %vm19_vm1, %v45_v6 }
  0x8b   :  { %v43_v8 = vpop.f32.mrf.mxu0 }
  0x8d   :  { %v51_v9 = vld [vmem:[#allocation2] sm:$0x3f] }
  0x8e   :  { %v56_v10 = vadd.f32 %v75_v7, %v51_v9 }
  0x90   :  { %v57_v11 = vmul.f32 %v56_v10, %v56_v10 }
  0x92   :  { %v58_v12 = vmul.f32 %v57_v11, %v56_v10 }
  0x94   :  { %v59_v13 = vmul.f32 0.044715, %v58_v12 }
  0x96   :  { %v60_v14 = vadd.f32 %v59_v13, %v56_v10 }
  0x98   :  { %v61_v15 = vmul.f32 0.7978846, %v60_v14 }
  0x9a   :  { %76 = vtanh.f32 %v61_v15 }
  0xa0   :  { %v77_v16 = vpop.eup %76 }
  0xa1   :  { %v63_v17 = vadd.f32 1.0, %v77_v16 }
  0xa3   :  { %v64_v18 = vmul.f32 0.5, %v63_v17 }
  0xa5   :  { %v65_v19 = vmul.f32 %v64_v18, %v56_v10 }
  0xa7   :  { %v66_v20 = vpack.c.bf16 %v65_v19, %v65_v19 }
  0xa9   :  { %68 = vst.msk [vmem:[%s114_s3] sm:$0x7] %vm67_vm3, %v66_v20 }

// kernel: _lambda_.6
= control target key start
LH: loop header
LB: loop body
LE: loop exit
PB: predicated region body
PF: predicated region fallthrough
CT: control target
= control target key end

     0   :  { %s645_s24 = smov 0   ;;  %s717_s0 = inlined_call_operand.vmem [shape: bf16[2,7,8], index: 0, kind: input, shape index: {}]   ;;  %s718_s1 = inlined_call_operand.vmem [shape: bf16[5,8,8], index: 1, kind: input, shape index: {}]   ;;  %s719_s2 = inlined_call_operand.vmem [shape: f32[1,8], index: 2, kind: input, shape index: {}]   ;;  %s720_s3 = inlined_call_operand.vmem [shape: bf16[8,16], index: 3, kind: input, shape index: {}]   ;;  %s721_s4 = inlined_call_operand.vmem [shape: f32[1,16], index: 4, kind: input, shape index: {}]   ;;  %s722_s5 = inlined_call_operand.vmem [shape: bf16[16,8], index: 5, kind: input, shape index: {}]   ;;  %s723_s6 = inlined_call_operand.vmem [shape: f32[1,8], index: 6, kind: input, shape index: {}]   ;;  %s724_s7 = inlined_call_operand.vmem [shape: bf16[2,7,8], index: 7, kind: output, shape index: {}]  }
   0x1 LB: > { %s557_s25 = sadd.s32 4294967295, %s602_s24   ;;  %p561_p0 = scmp.ge.s32.totalorder %s602_s24, 1  ;;  %s602_s24 = sphi %s645_s24, %s17_s24  }
   0x2   : > { %p236_p1 = scmp.lt.s32.totalorder %s602_s24, 3 }
   0x4   : > { %p237_p2 = pnand %p561_p0, %p236_p1 }
   0x5   : > { %p266_p3 = scmp.lt.s32.totalorder (!%p237_p2), %s557_s25, 1 }
   0x6   : > { %240 = sbr.rel (%p237_p2) target bundleno = 460 (0x1cc), region = 48 }
   0xb   : > { %v281_v0 = vld [vmem:[%s718_s1] sm:$0xf]  ;;  %vm286_vm0 = vcmask 1043456   ;;  %vm282_vm1 = vcmask 64512   ;;  %vm490_vm2 = vcmask 57344   ;;  %s726_s25 = smov (!%p266_p3, %s557_s25), 1 }
   0xc   : > { %v288_v1 = vsel %vm286_vm0, %v281_v0, 0  ;;  %vm493_vm3 = vsmask.f32 3338  ;;  %vm492_vm4 = vcmask 60418   ;;  %v571_v2 = vld [vmem:[%s718_s1 + $0x10] sm:$0xf] }
   0xd   : > { %297 = vmatpush.bf16.msra.mxu0 %v288_v1  ;;  %v567_v3 = vld [vmem:[%s718_s1 + $0x8] sm:$0xf]  ;;  %v404_v4 = vsel %vm286_vm0, %v571_v2, 0  ;;  %v565_v6 = vld [vmem:[%s718_s1 + $0x4] sm:$0xf]  ;;  %s562_s13 = sshll.u32 %s726_s25, 2  ;;  %vm494_vm5 = vmand %vm492_vm4, %vm493_vm3 }
   0xe   : > { %v347_v5 = vsel %vm286_vm0, %v567_v3, 0  ;;  %v569_v7 = vld [vmem:[%s718_s1 + $0xc] sm:$0xf]  ;;  %v320_v8 = vsel %vm286_vm0, %v565_v6, 0  ;;  %s269_s16 = scalar_lea.vmem %s717_s0, %s562_s13  ;;  %s679_s19 = scalar_lea.vmem %s724_s7, %s562_s13  ;;  %v604_v15 = vmov 0   ;;  %v581_v52 = vld [vmem:[%s722_s5] sm:$0xff] }
   0xf   : > { %356 = vmatpush.bf16.msra.mxu2 %v347_v5  ;;  %v377_v9 = vsel %vm286_vm0, %v569_v7, 0  ;;  %329 = vmatpush.bf16.msra.mxu1 %v320_v8  ;;  %v280_v10 = vld [vmem:[%s269_s16] sm:$0x3]  ;;  %v393_v14 = vld [vmem:[%s269_s16] sm:$0xc]  ;;  %vm467_vm6 = vcmask 130048  }
  0x10   : > { %386 = vmatpush.bf16.msra.mxu3 %v377_v9  ;;  %v682_v11 = vld [vmem:[%s269_s16] sm:$0x6]  ;;  %564 = vmatmul.msk.bf16.vlgmr.msra.gmra.mxu0 %vm282_vm1, %v280_v10  ;;  %v307_v12 = vunpack.c.l.b16 %v280_v10  ;;  %491 = vst.msk [vmem:[%s679_s19] sm:$0x1] %vm490_vm2, %v604_v15  ;;  %v397_v20 = vunpack.c.l.b16 %v393_v14  ;;  %v591_v36 = vld [vmem:[%s719_s2] ss:$0 sm:$0xff] }
  0x11   : > { %413 = vmatpush.bf16.msrb.mxu0 %v404_v4  ;;  %v340_v13 = vunpack.c.l.b16 %v682_v11  ;;  %v495_v16 = vld [vmem:[%s679_s19] sm:$0xc]  ;;  %v592_v53 = vld [vmem:[%s721_s4] ss:$0 sm:$0xff]  ;;  %v484_v6 = vunpack.c.l.bf16 %v682_v11  ;;  %vm498_vm7 = vcmask 59393  }
  0x12   : > { %v496_v17 = vsel %vm494_vm5, 0, %v495_v16  ;;  %v308_v18 = vpack.c.b16 %v307_v12, %v307_v12  ;;  %v398_v29 = vpack.c.b16 %v397_v20, %v397_v20  ;;  %v421_v33 = vld [vmem:[%s720_s3] sm:$0xf]  ;;  %vm499_vm8 = vsmask.f32 2304 }
  0x13   : > { %v341_v19 = vpack.c.b16 %v340_v13, %v340_v13  ;;  %497 = vst [vmem:[%s679_s19] sm:$0xc] %v496_v17  ;;  %v430_v34 = vsel %vm286_vm0, %v421_v33, 0  ;;  %478 = vmatpush.bf16.msrb.mxu2 %v581_v52  ;;  %v593_v3 = vld [vmem:[%s723_s6] ss:$0 sm:$0xff]  ;;  %vm500_vm9 = vmand %vm498_vm7, %vm499_vm8 }
  0x14   : > { %v310_v21 = vshrl.u32 %v308_v18, 16  ;;  %v312_v22 = vshll.u32 %v308_v18, 16  ;;  %v399_v32 = vrot.slane %v398_v29, 2  ;;  %439 = vmatpush.bf16.msrb.mxu1 %v430_v34 }
  0x15   : > { %v342_v23 = vrot.slane %v341_v19, 1  ;;  %v366_v24 = vshrl.u32 %v341_v19, 16  ;;  %v369_v25 = vshll.u32 %v341_v19, 16 }
  0x16   : > { %v314_v26 = vrot.slane %v312_v22, 1 }
  0x17   : > { %568 = vmatmul.msk.bf16.vlgmr.msra.gmra.mxu2 %vm282_vm1, %v342_v23  ;;  %v368_v27 = vrot.slane %v366_v24, 1  ;;  %v371_v28 = vrot.slane %v369_v25, 2 }
  0x18   : > { %v315_v30 = vor.u32 %v314_v26, %v310_v21 }
  0x19   : > { %v372_v31 = vor.u32 %v371_v28, %v368_v27 }
  0x1a   : > { %566 = vmatmul.msk.bf16.vlgmr.msra.gmra.mxu1 %vm282_vm1, %v315_v30  ;;  %v501_v9 = vld [vmem:[%s679_s19] sm:$0x6] }
  0x1b   : > { %570 = vmatmul.msk.bf16.vlgmr.msra.gmra.mxu3 %vm282_vm1, %v372_v31 }
  0x20   : > { %572 = vmatmul.msk.bf16.vlgmr.msrb.gmra.mxu0 %vm282_vm1, %v399_v32 }
  0x8d   : > { %v299_v35 = vpop.f32.mrf.mxu0 }
  0x8e   : > { %v303_v38 = vadd.f32 %v591_v36, %v299_v35 }
  0x95   : > { %v301_v37 = vpop.f32.mrf.mxu0 }
  0x97   : > { %v331_v39 = vpop.f32.mrf.mxu1 }
  0x98   : > { %v335_v40 = vadd.f32 %v331_v39, %v303_v38 }
  0x9a   : > { %v358_v41 = vpop.f32.mrf.mxu2 }
  0x9b   : > { %v362_v42 = vadd.f32 %v358_v41, %v335_v40 }
  0x9d   : > { %v415_v43 = vpop.f32.mrf.mxu0 }
  0x9e   : > { %v388_v44 = vpop.f32.mrf.mxu3 }
  0x9f   : > { %v392_v45 = vadd.f32 %v388_v44, %v362_v42  ;;  %v333_v46 = vpop.f32.mrf.mxu1 }
  0xa1   : > { %v419_v47 = vadd.f32 %v415_v43, %v392_v45 }
  0xa2   : > { %v360_v48 = vpop.f32.mrf.mxu2 }
  0xa3   : > { %v420_v49 = vpack.c.bf16 %v419_v47, %v419_v47 }
  0xa5   : > { %573 = vmatmul.msk.bf16.vlgmr.msrb.gmra.mxu1 %vm282_vm1, %v420_v49  ;;  %v417_v50 = vpop.f32.mrf.mxu0 }
  0xa6   : > { %v390_v51 = vpop.f32.mrf.mxu3 }
 0x122   : > { %v441_v54 = vpop.f32.mrf.mxu1 }
 0x123   : > { %v442_v55 = vadd.f32 %v592_v53, %v441_v54 }
 0x125   : > { %v445_v56 = vmul.f32 %v442_v55, %v442_v55 }
 0x127   : > { %v446_v57 = vmul.f32 %v445_v56, %v442_v55 }
 0x129   : > { %v447_v58 = vmul.f32 0.044715, %v446_v57 }
 0x12a   : > { %v443_v59 = vpop.f32.mrf.mxu1 }
 0x12b   : > { %v448_v60 = vadd.f32 %v447_v58, %v442_v55 }
 0x12d   : > { %v449_v61 = vmul.f32 0.7978846, %v448_v60 }
 0x12f   : > { %594 = vtanh.f32 %v449_v61 }
 0x135   : > { %v595_v62 = vpop.eup %594 }
 0x136   : > { %v451_v63 = vadd.f32 1.0, %v595_v62 }
 0x138   : > { %v452_v0 = vmul.f32 0.5, %v451_v63 }
 0x13a   : > { %v453_v1 = vmul.f32 %v452_v0, %v442_v55 }
 0x13c   : > { %v454_v2 = vpack.c.bf16 %v453_v1, %v453_v1 }
 0x13e   : > { %578 = vmatmul.msk.bf16.vlgmr.msrb.gmra.mxu2 %vm467_vm6, %v454_v2 }
 0x1c1   : > { %v480_v4 = vpop.f32.mrf.mxu2 }
 0x1c2   : > { %v481_v5 = vadd.f32 %v593_v3, %v480_v4 }
 0x1c4   : > { %v486_v7 = vrot.slane %v481_v5, 6 }
 0x1c6   : > { %v488_v8 = vadd.f32 %v486_v7, %v484_v6 }
 0x1c8   : > { %v489_v10 = vpack.c.bf16 %v488_v8, %v488_v8 }
 0x1c9   : > { %v482_v12 = vpop.f32.mrf.mxu2 }
 0x1ca   : > { %v502_v13 = vsel %vm500_vm9, %v489_v10, %v501_v9 }
 0x1cb   : > { %503 = vst [vmem:[%s679_s19] sm:$0x6] %v502_v13 }
 0x1cc PF: > { %s17_s24 = sadd.s32 1, %s602_s24  }
 0x1cd   : > { %p14_p4 = scmp.ge.s32.totalorder %s17_s24, 4  }
 0x1cf   :  { %16 = sbr.rel (!%p14_p4) target bundleno = 1 (0x1), region = 82 }

// kernel: _lambda_.9
= control target key start
LH: loop header
LB: loop body
LE: loop exit
PB: predicated region body
PF: predicated region fallthrough
CT: control target
= control target key end

     0   :  { %vm19_vm0 = vcmask 259072   ;;  %v73_v1 = vmov 0.0   ;;  %vm31_vm1 = vcmask 130048   ;;  %s109_s1 = inlined_call_operand.vmem [shape: bf16[16,32], index: 1, kind: input, shape index: {}]   ;;  %s110_s0 = inlined_call_operand.vmem [shape: bf16[6,16], index: 0, kind: input, shape index: {}]   ;;  %s111_s2 = inlined_call_operand.vmem [shape: f32[1,32], index: 2, kind: input, shape index: {}]   ;;  %s112_s3 = inlined_call_operand.vmem [shape: f32[6,32], index: 3, kind: output, shape index: {}]  }
   0x1   :  { %v70_v0 = vld [vmem:[%s109_s1] sm:$0xff]  ;;  %20 = vst.msk [vmem:[#allocation2] sm:$0x3f] %vm19_vm0, %v73_v1 }
   0x2   :  { %42 = vmatpush.bf16.msra.mxu0 %v70_v0  ;;  %v22_v2 = vld [vmem:[%s110_s0] sm:$0x7] }
   0x3   :  { %v72_v6 = vld [vmem:[%s111_s2] ss:$0 sm:$0xff] }
   0x5   :  { %69 = vmatmul.msk.bf16.vlgmr.msra.gmra.mxu0 %vm31_vm1, %v22_v2 }
   0x8   :  { %v21_v3 = vld [vmem:[#allocation2] sm:$0x3f] }
  0x82   :  { %v44_v4 = vpop.f32.mrf.mxu0 }
  0x83   :  { %v48_v5 = vadd.f32 %v44_v4, %v21_v3 }
  0x85   :  { %50 = vst.msk [vmem:[#allocation2] sm:$0x3f] %vm19_vm0, %v48_v5 }
  0x8a   :  { %v46_v7 = vpop.f32.mrf.mxu0 }
  0x8c   :  { %v54_v8 = vld [vmem:[#allocation2] sm:$0x3f] }
  0x8d   :  { %v59_v9 = vadd.f32 %v72_v6, %v54_v8 }
  0x8f   :  { %60 = vst.msk [vmem:[%s112_s3] sm:$0x3f] %vm19_vm0, %v59_v9 }

</bundles_post_ra>
